<compile_context>
chip_gen: v7x
topology: tpu7x:2x2x1
jax: 0.10.0
libtpu: 0.0.40
codegen_flags: <defaults>
</compile_context>

<pallas_src>
import functools

import jax
import jax.numpy as jnp
from jax import lax
from jax.experimental import pallas as pl
from jax.experimental.pallas import tpu as pltpu

LANES = 128


def _round_up(x, m):
    return (x + m - 1) // m * m


def _choose_tm(Mp, tm_max=128):
    """Mp is a multiple of 16.  Prefer >= 2 M blocks so both v7x TensorCores
    get work; otherwise a single full-M block."""
    for t in (128, 64, 32, 16):
        if t <= tm_max and Mp % t == 0 and Mp // t >= 2:
            return t
    return Mp


# ----------------------------------------------------------------------------
# Pallas kernel: fused MLP  h_{l+1} = relu?(h_l @ W_l + b_l)
#   * bf16 MXU operands, f32 accumulation (preferred_element_type)
#   * all weights/biases resident in VMEM, grid over M blocks only
#   * no K grid / scratch accumulator (K always fits in a single block here)
# ----------------------------------------------------------------------------
def _fused_mlp_kernel(x_ref, *refs, relu_flags):
    n = len(relu_flags)
    o_ref = refs[2 * n]
    h = x_ref[...]
    for l in range(n):
        w_ref, b_ref = refs[2 * l], refs[2 * l + 1]
        acc = jnp.dot(h, w_ref[...], preferred_element_type=jnp.float32)
        acc = acc + b_ref[...]
        if relu_flags[l]:
            acc = jnp.maximum(acc, 0.0)
        h = acc.astype(jnp.bfloat16) if l < n - 1 else acc
    o_ref[...] = h.astype(o_ref.dtype)


def pallas_fused_mlp(x, layers, *, out_dtype, tm_max=128):
    """x: (M, K0).  layers: [(w (K_l, N_l) bf16, b (1, N_l) f32, relu: bool)].

    K_l, N_l are pre-padded multiples of 128 (done once at init).
    Returns (round_up(M, 16), N_last); rows beyond M are padding."""
    M, K0 = x.shape
    assert layers[0][0].shape[0] == K0, (layers[0][0].shape, K0)

    x = x.astype(jnp.bfloat16)
    Mp = _round_up(M, 16)
    if Mp != M:
        x = jnp.pad(x, ((0, Mp - M), (0, 0)))
    tm = _choose_tm(Mp, tm_max)

    relu_flags = tuple(bool(r) for _, _, r in layers)
    n_last = layers[-1][0].shape[1]

    in_specs = [pl.BlockSpec((tm, K0), lambda i: (i, 0))]
    operands = [x]
    flops = 0
    w_bytes = 0
    k_prev = K0
    for w, b, _ in layers:
        Kl, Nl = w.shape
        assert Kl == k_prev, (Kl, k_prev)
        in_specs.append(pl.BlockSpec((Kl, Nl), lambda i: (0, 0)))
        in_specs.append(pl.BlockSpec((1, Nl), lambda i: (0, 0)))
        operands += [w, b]
        flops += 2 * Mp * Kl * Nl
        w_bytes += Kl * Nl * 2 + Nl * 4
        k_prev = Nl

    out_bytes = Mp * n_last * jnp.dtype(out_dtype).itemsize
    kernel = functools.partial(_fused_mlp_kernel, relu_flags=relu_flags)

    return pl.pallas_call(
        kernel,
        out_shape=jax.ShapeDtypeStruct((Mp, n_last), out_dtype),
        grid=(Mp // tm,),
        in_specs=in_specs,
        out_specs=pl.BlockSpec((tm, n_last), lambda i: (i, 0)),
        compiler_params=pltpu.CompilerParams(
            dimension_semantics=("parallel",)),
        cost_estimate=pl.CostEstimate(
            flops=flops, transcendentals=0,
            bytes_accessed=Mp * K0 * 2 + w_bytes + out_bytes),
    )(*operands)


# ----------------------------------------------------------------------------
# Patch extraction: one identity-kernel grouped conv (replaces the old
# kh*kw-way slice+concat with lane-misaligned minor dims).
# ----------------------------------------------------------------------------
def _extract_patches_nhwc(x, kh, kw, stride):
    """x: (B, H, W, C) -> (B, Ho, Wo, C*kh*kw) with feature order
    (c, i, j): channel-major, row-major kernel taps."""
    B, H, W, C = x.shape
    S = kh * kw
    eye = jnp.eye(S, dtype=x.dtype).reshape(kh, kw, S)        # eye[i,j,s]=(s==i*kw+j)
    rhs = jnp.broadcast_to(eye[:, :, None, :], (kh, kw, C, S))
    rhs = rhs.reshape(kh, kw, 1, C * S)                       # HWIO, O index = c*S + s
    return lax.conv_general_dilated(
        x, rhs, window_strides=(stride, stride), padding="VALID",
        dimension_numbers=("NHWC", "HWIO", "NHWC"),
        feature_group_count=C)


def conv_relu_layer(x, wb, kh, kw, stride):
    """x: (B, H, W, C) bf16 NHWC (C possibly already lane-padded).
    wb = (w_mat (Kp, 128) bf16, b_row (1, 128) f32), prepared at init.
    Returns (B, Ho, Wo, 128) bf16 (out channels zero-padded to 128 lanes)."""
    w_mat, b_row = wb
    B, H, W, C = x.shape
    Ho = (H - kh) // stride + 1
    Wo = (W - kw) // stride + 1

    patches = _extract_patches_nhwc(x, kh, kw, stride)
    M, K = B * Ho * Wo, C * kh * kw
    patches = patches.reshape(M, K)
    Kp = w_mat.shape[0]
    if Kp != K:
        patches = jnp.pad(patches, ((0, 0), (0, Kp - K)))

    y = pallas_fused_mlp(patches, [(w_mat, b_row, True)], out_dtype=jnp.bfloat16)
    if y.shape[0] != M:
        y = y[:M]
    return y.reshape(B, Ho, Wo, LANES)


# ----------------------------------------------------------------------------
# One-time weight preprocessing (hoisted out of the forward pass)
# ----------------------------------------------------------------------------
def prepare_params(params, input_shape, num_actions):
    C, H, W = input_shape
    bf = jnp.bfloat16
    CP = LANES

    def sz(h, k, s):
        return (h - k) // s + 1

    H1, W1 = sz(H, 8, 4), sz(W, 8, 4)
    H2, W2 = sz(H1, 4, 2), sz(W1, 4, 2)
    H3, W3 = sz(H2, 3, 1), sz(W2, 3, 1)
    assert H3 >= 1 and W3 >= 1, "input spatially too small for the conv stack"

    def conv_mat(w, in_c_pad):
        # (OutC, InC, kh, kw) -> (round_up(in_c_pad*kh*kw, 128), 128) bf16,
        # rows ordered (in_c, kh, kw) channel-major to match patch extraction.
        out_c, in_c, kh, kw = w.shape
        w = jnp.pad(w, ((0, 0), (0, in_c_pad - in_c), (0, 0), (0, 0)))
        m = w.reshape(out_c, in_c_pad * kh * kw).T
        kp = _round_up(m.shape[0], LANES)
        m = jnp.pad(m, ((0, kp - m.shape[0]),
                        (0, _round_up(out_c, LANES) - out_c)))
        return m.astype(bf)

    def bias_row(b, n_pad):
        return jnp.pad(b, (0, n_pad - b.shape[0])).reshape(1, n_pad).astype(jnp.float32)

    tensors = {
        "conv1": (conv_mat(params["w1"], C), bias_row(params["b1"], CP)),
        "conv2": (conv_mat(params["w2"], CP), bias_row(params["b2"], CP)),
    }

    # FC1: PyTorch flatten is (C, H, W)-ordered; permute the columns once to
    # the NHWC-with-padded-channels flatten order (h, w, c_pad).
    wf1 = params["wf1"].reshape(512, 64, H3, W3).transpose(2, 3, 1, 0)  # (H3,W3,64,512)
    wf1 = jnp.pad(wf1, ((0, 0), (0, 0), (0, CP - 64), (0, 0)))
    wf1_mat = wf1.reshape(H3 * W3 * CP, 512).astype(bf)
    bf1_row = params["bf1"].reshape(1, 512).astype(jnp.float32)

    Ap = _round_up(num_actions, LANES)
    wf2_mat = jnp.pad(params["wf2"].T, ((0, 0), (0, Ap - num_actions))).astype(bf)
    bf2_row = bias_row(params["bf2"], Ap)

    if H3 == 1 and W3 == 1:
        # conv3 covers its whole (3,3) input window -> express it as a linear
        # layer over the flattened (h, w, c_pad) conv2 activation and fuse
        # conv3 + FC1 + FC2 into a single pallas_call.
        w3 = jnp.transpose(params["w3"], (2, 3, 1, 0))            # (3,3,InC,OutC)
        w3 = jnp.pad(w3, ((0, 0), (0, 0), (0, CP - 64), (0, CP - 64)))
        w3_tail = w3.reshape(3 * 3 * CP, CP).astype(bf)
        b3_row = bias_row(params["b3"], CP)
        tensors["tail"] = [(w3_tail, b3_row), (wf1_mat, bf1_row), (wf2_mat, bf2_row)]
    else:
        # General path: conv3 as its own layer, then fused FC1+FC2 head.
        tensors["conv3"] = (conv_mat(params["w3"], CP), bias_row(params["b3"], CP))
        tensors["tail"] = [(wf1_mat, bf1_row), (wf2_mat, bf2_row)]

    return tensors


# ----------------------------------------------------------------------------
# DQN forward (matches PyTorch module semantics; NCHW input at the boundary)
# ----------------------------------------------------------------------------
def dqn_forward(x_nchw, tensors, num_actions):
    x = jnp.transpose(x_nchw, (0, 2, 3, 1)).astype(jnp.bfloat16)   # NCHW -> NHWC once
    x = conv_relu_layer(x, tensors["conv1"], 8, 8, 4)
    x = conv_relu_layer(x, tensors["conv2"], 4, 4, 2)
    B = x.shape[0]

    if "conv3" in tensors:                     # general path (conv3 output > 1x1)
        x = conv_relu_layer(x, tensors["conv3"], 3, 3, 1)

    # Flatten the (channel-padded) NHWC activation; tail weights were permuted
    # and zero-padded at init to match this ordering exactly.
    x_flat = x.reshape(B, x.shape[1] * x.shape[2] * x.shape[3])
    tail = tensors["tail"]
    relu_flags = [True] * (len(tail) - 1) + [False]
    layers = [(w, b, r) for (w, b), r in zip(tail, relu_flags)]
    q = pallas_fused_mlp(x_flat, layers, out_dtype=jnp.float32)
    return q[:B, :num_actions]


# ----------------------------------------------------------------------------
# Pure-JAX reference (mirrors the bf16-operand / f32-accumulate numerics)
# ----------------------------------------------------------------------------
def dqn_reference(x, params):
    bf = jnp.bfloat16

    def conv(x, w, b, s):
        y = lax.conv_general_dilated(
            x.astype(bf), w.astype(bf), window_strides=(s, s), padding="VALID",
            dimension_numbers=("NCHW", "OIHW", "NCHW"),
            preferred_element_type=jnp.float32)
        return jax.nn.relu(y + b[None, :, None, None]).astype(bf)

    x = conv(x, params["w1"], params["b1"], 4)
    x = conv(x, params["w2"], params["b2"], 2)
    x = conv(x, params["w3"], params["b3"], 1)
    x = x.reshape(x.shape[0], -1)
    h = jax.nn.relu(
        jnp.dot(x, params["wf1"].T.astype(bf),
                preferred_element_type=jnp.float32) + params["bf1"]).astype(bf)
    return (jnp.dot(h, params["wf2"].T.astype(bf),
                    preferred_element_type=jnp.float32) + params["bf2"])


# ----------------------------------------------------------------------------
# Deterministic parameter init (shapes from DQN.__init__; synthetic weights)
# ----------------------------------------------------------------------------
def init_params(key, in_channels, feature_size, num_actions):
    ks = jax.random.split(key, 10)

    def u(k, shape, fan_in):
        bound = 1.0 / jnp.sqrt(fan_in)
        return jax.random.uniform(k, shape, jnp.float32, -bound, bound)

    return {
        "w1": u(ks[0], (32, in_channels, 8, 8), in_channels * 8 * 8),
        "b1": u(ks[1], (32,), in_channels * 8 * 8),
        "w2": u(ks[2], (64, 32, 4, 4), 32 * 4 * 4),
        "b2": u(ks[3], (64,), 32 * 4 * 4),
        "w3": u(ks[4], (64, 64, 3, 3), 64 * 3 * 3),
        "b3": u(ks[5], (64,), 64 * 3 * 3),
        "wf1": u(ks[6], (512, feature_size), feature_size),
        "bf1": u(ks[7], (512,), feature_size),
        "wf2": u(ks[8], (num_actions, 512), 512),
        "bf2": u(ks[9], (num_actions,), 512),
    }


if __name__ == "__main__":
    # Smallest shapes consistent with the module: conv stack (k8/s4 -> k4/s2
    # -> k3/s1, VALID) needs H=W>=36.  Input: batch=2, channels=4, 36x36 NCHW.
    B, C, H, W = 2, 4, 36, 36
    num_actions = 5
    # feature_size: 36 -> 8 -> 3 -> 1 spatial, 64 channels => 64
    feature_size = 64 * 1 * 1

    key = jax.random.PRNGKey(0)
    kx, kp = jax.random.split(key)
    x = jax.random.normal(kx, (B, C, H, W), jnp.float32)
    params = init_params(kp, C, feature_size, num_actions)

    # One-time weight preprocessing (pad/permute/cast) -- not in the hot path.
    tensors = prepare_params(params, (C, H, W), num_actions)

    fwd = jax.jit(dqn_forward, static_argnums=(2,))
    out = fwd(x, tensors, num_actions)
    out = jax.block_until_ready(out)

    ref = dqn_reference(x, params)
    assert out.shape == (B, num_actions), out.shape
    assert jnp.allclose(out, ref, atol=1e-2, rtol=1e-2), "mismatch vs reference"

    print("KERNEL_OK")
</pallas_src>

<mosaic_0001>
module attributes {stable_mosaic.version = 11 : i64} {
  func.func @_fused_mlp_kernel(%arg0: i32, %arg1: memref<64x256xbf16, #tpu.memory_space<vmem>>, %arg2: memref<256x128xbf16, #tpu.memory_space<vmem>>, %arg3: memref<1x128xf32, #tpu.memory_space<vmem>>, %arg4: memref<64x128xbf16, #tpu.memory_space<vmem>>) attributes {dimension_semantics = [#tpu.dimension_semantics<parallel>], iteration_bounds = array<i64: 2>, scalar_prefetch = 0 : i64, scratch_operands = 0 : i64, tpu.core_type = #tpu.core_type<tc>, window_params = [{transform_indices = @transform_0, window_bounds = array<i64: 64, 256>}, {pipeline_mode = #tpu.pipeline_mode<synchronous>, transform_indices = @transform_1, window_bounds = array<i64: 256, 128>}, {pipeline_mode = #tpu.pipeline_mode<synchronous>, transform_indices = @transform_2, window_bounds = array<i64: 1, 128>}, {transform_indices = @transform_3, window_bounds = array<i64: 64, 128>}]} {
    %c0 = arith.constant 0 : index
    %c0_0 = arith.constant 0 : index
    %0 = vector.load %arg1[%c0, %c0_0] : memref<64x256xbf16, #tpu.memory_space<vmem>>, vector<64x256xbf16>
    %c0_1 = arith.constant 0 : index
    %c0_2 = arith.constant 0 : index
    %1 = vector.load %arg2[%c0_1, %c0_2] : memref<256x128xbf16, #tpu.memory_space<vmem>>, vector<256x128xbf16>
    %cst = arith.constant dense<0.000000e+00> : vector<64x128xf32>
    %2 = tpu.matmul %0, %1, %cst {dimension_numbers = #tpu.dot_dimension_numbers<[1], [0], [0], [1], [0, 0, 1, 1], [], []>} : vector<64x256xbf16>, vector<256x128xbf16>, vector<64x128xf32> -> vector<64x128xf32>
    %c0_3 = arith.constant 0 : index
    %c0_4 = arith.constant 0 : index
    %3 = vector.load %arg3[%c0_3, %c0_4] : memref<1x128xf32, #tpu.memory_space<vmem>>, vector<1x128xf32>
    %4 = vector.broadcast %3 : vector<1x128xf32> to vector<64x128xf32>
    %5 = arith.addf %2, %4 : vector<64x128xf32>
    %cst_5 = arith.constant 0.000000e+00 : f32
    %6 = vector.broadcast %cst_5 : f32 to vector<64x128xf32>
    %7 = arith.maximumf %5, %6 : vector<64x128xf32>
    %8 = arith.truncf %7 : vector<64x128xf32> to vector<64x128xbf16>
    %c0_6 = arith.constant 0 : index
    %c0_7 = arith.constant 0 : index
    %9 = vector.load %arg4[%c0_6, %c0_7] : memref<64x128xbf16, #tpu.memory_space<vmem>>, vector<64x128xbf16>
    tpu.vector_store %arg4[%c0_6, %c0_7], %8 {strides = array<i32>} : memref<64x128xbf16, #tpu.memory_space<vmem>>, vector<64x128xbf16>,
    return
  }
  func.func @transform_0(%arg0: i32) -> (i32, i32) {
    %c0_i32 = arith.constant 0 : i32
    %c0_i32_0 = arith.constant 0 : i32
    return %arg0, %c0_i32 : i32, i32
  }
  func.func @transform_1(%arg0: i32) -> (i32, i32) {
    %c0_i32 = arith.constant 0 : i32
    %c0_i32_0 = arith.constant 0 : i32
    %c0_i32_1 = arith.constant 0 : i32
    return %c0_i32, %c0_i32_0 : i32, i32
  }
  func.func @transform_2(%arg0: i32) -> (i32, i32) {
    %c0_i32 = arith.constant 0 : i32
    %c0_i32_0 = arith.constant 0 : i32
    %c0_i32_1 = arith.constant 0 : i32
    return %c0_i32, %c0_i32_0 : i32, i32
  }
  func.func @transform_3(%arg0: i32) -> (i32, i32) {
    %c0_i32 = arith.constant 0 : i32
    %c0_i32_0 = arith.constant 0 : i32
    return %arg0, %c0_i32 : i32, i32
  }
}

module attributes {stable_mosaic.version = 11 : i64} {
  func.func @_fused_mlp_kernel(%arg0: i32, %arg1: memref<16x2048xbf16, #tpu.memory_space<vmem>>, %arg2: memref<2048x128xbf16, #tpu.memory_space<vmem>>, %arg3: memref<1x128xf32, #tpu.memory_space<vmem>>, %arg4: memref<16x128xbf16, #tpu.memory_space<vmem>>) attributes {dimension_semantics = [#tpu.dimension_semantics<parallel>], iteration_bounds = array<i64: 2>, scalar_prefetch = 0 : i64, scratch_operands = 0 : i64, tpu.core_type = #tpu.core_type<tc>, window_params = [{transform_indices = @transform_0, window_bounds = array<i64: 16, 2048>}, {pipeline_mode = #tpu.pipeline_mode<synchronous>, transform_indices = @transform_1, window_bounds = array<i64: 2048, 128>}, {pipeline_mode = #tpu.pipeline_mode<synchronous>, transform_indices = @transform_2, window_bounds = array<i64: 1, 128>}, {transform_indices = @transform_3, window_bounds = array<i64: 16, 128>}]} {
    %c0 = arith.constant 0 : index
    %c0_0 = arith.constant 0 : index
    %0 = vector.load %arg1[%c0, %c0_0] : memref<16x2048xbf16, #tpu.memory_space<vmem>>, vector<16x2048xbf16>
    %c0_1 = arith.constant 0 : index
    %c0_2 = arith.constant 0 : index
    %1 = vector.load %arg2[%c0_1, %c0_2] : memref<2048x128xbf16, #tpu.memory_space<vmem>>, vector<2048x128xbf16>
    %cst = arith.constant dense<0.000000e+00> : vector<16x128xf32>
    %2 = tpu.matmul %0, %1, %cst {dimension_numbers = #tpu.dot_dimension_numbers<[1], [0], [0], [1], [0, 0, 1, 1], [], []>} : vector<16x2048xbf16>, vector<2048x128xbf16>, vector<16x128xf32> -> vector<16x128xf32>
    %c0_3 = arith.constant 0 : index
    %c0_4 = arith.constant 0 : index
    %3 = vector.load %arg3[%c0_3, %c0_4] : memref<1x128xf32, #tpu.memory_space<vmem>>, vector<1x128xf32>
    %4 = vector.broadcast %3 : vector<1x128xf32> to vector<16x128xf32>
    %5 = arith.addf %2, %4 : vector<16x128xf32>
    %cst_5 = arith.constant 0.000000e+00 : f32
    %6 = vector.broadcast %cst_5 : f32 to vector<16x128xf32>
    %7 = arith.maximumf %5, %6 : vector<16x128xf32>
    %8 = arith.truncf %7 : vector<16x128xf32> to vector<16x128xbf16>
    %c0_6 = arith.constant 0 : index
    %c0_7 = arith.constant 0 : index
    %9 = vector.load %arg4[%c0_6, %c0_7] : memref<16x128xbf16, #tpu.memory_space<vmem>>, vector<16x128xbf16>
    tpu.vector_store %arg4[%c0_6, %c0_7], %8 {strides = array<i32>} : memref<16x128xbf16, #tpu.memory_space<vmem>>, vector<16x128xbf16>,
    return
  }
  func.func @transform_0(%arg0: i32) -> (i32, i32) {
    %c0_i32 = arith.constant 0 : i32
    %c0_i32_0 = arith.constant 0 : i32
    return %arg0, %c0_i32 : i32, i32
  }
  func.func @transform_1(%arg0: i32) -> (i32, i32) {
    %c0_i32 = arith.constant 0 : i32
    %c0_i32_0 = arith.constant 0 : i32
    %c0_i32_1 = arith.constant 0 : i32
    return %c0_i32, %c0_i32_0 : i32, i32
  }
  func.func @transform_2(%arg0: i32) -> (i32, i32) {
    %c0_i32 = arith.constant 0 : i32
    %c0_i32_0 = arith.constant 0 : i32
    %c0_i32_1 = arith.constant 0 : i32
    return %c0_i32, %c0_i32_0 : i32, i32
  }
  func.func @transform_3(%arg0: i32) -> (i32, i32) {
    %c0_i32 = arith.constant 0 : i32
    %c0_i32_0 = arith.constant 0 : i32
    return %arg0, %c0_i32 : i32, i32
  }
}

module attributes {stable_mosaic.version = 11 : i64} {
  func.func @_fused_mlp_kernel(%arg0: i32, %arg1: memref<16x1152xbf16, #tpu.memory_space<vmem>>, %arg2: memref<1152x128xbf16, #tpu.memory_space<vmem>>, %arg3: memref<1x128xf32, #tpu.memory_space<vmem>>, %arg4: memref<128x512xbf16, #tpu.memory_space<vmem>>, %arg5: memref<1x512xf32, #tpu.memory_space<vmem>>, %arg6: memref<512x128xbf16, #tpu.memory_space<vmem>>, %arg7: memref<1x128xf32, #tpu.memory_space<vmem>>, %arg8: memref<16x128xf32, #tpu.memory_space<vmem>>) attributes {dimension_semantics = [#tpu.dimension_semantics<parallel>], iteration_bounds = array<i64: 1>, scalar_prefetch = 0 : i64, scratch_operands = 0 : i64, tpu.core_type = #tpu.core_type<tc>, window_params = [{transform_indices = @transform_0, window_bounds = array<i64: 16, 1152>}, {pipeline_mode = #tpu.pipeline_mode<synchronous>, transform_indices = @transform_1, window_bounds = array<i64: 1152, 128>}, {pipeline_mode = #tpu.pipeline_mode<synchronous>, transform_indices = @transform_2, window_bounds = array<i64: 1, 128>}, {pipeline_mode = #tpu.pipeline_mode<synchronous>, transform_indices = @transform_3, window_bounds = array<i64: 128, 512>}, {pipeline_mode = #tpu.pipeline_mode<synchronous>, transform_indices = @transform_4, window_bounds = array<i64: 1, 512>}, {pipeline_mode = #tpu.pipeline_mode<synchronous>, transform_indices = @transform_5, window_bounds = array<i64: 512, 128>}, {pipeline_mode = #tpu.pipeline_mode<synchronous>, transform_indices = @transform_6, window_bounds = array<i64: 1, 128>}, {transform_indices = @transform_7, window_bounds = array<i64: 16, 128>}]} {
    %c0 = arith.constant 0 : index
    %c0_0 = arith.constant 0 : index
    %0 = vector.load %arg1[%c0, %c0_0] : memref<16x1152xbf16, #tpu.memory_space<vmem>>, vector<16x1152xbf16>
    %c0_1 = arith.constant 0 : index
    %c0_2 = arith.constant 0 : index
    %1 = vector.load %arg2[%c0_1, %c0_2] : memref<1152x128xbf16, #tpu.memory_space<vmem>>, vector<1152x128xbf16>
    %cst = arith.constant dense<0.000000e+00> : vector<16x128xf32>
    %2 = tpu.matmul %0, %1, %cst {dimension_numbers = #tpu.dot_dimension_numbers<[1], [0], [0], [1], [0, 0, 1, 1], [], []>} : vector<16x1152xbf16>, vector<1152x128xbf16>, vector<16x128xf32> -> vector<16x128xf32>
    %c0_3 = arith.constant 0 : index
    %c0_4 = arith.constant 0 : index
    %3 = vector.load %arg3[%c0_3, %c0_4] : memref<1x128xf32, #tpu.memory_space<vmem>>, vector<1x128xf32>
    %4 = vector.broadcast %3 : vector<1x128xf32> to vector<16x128xf32>
    %5 = arith.addf %2, %4 : vector<16x128xf32>
    %cst_5 = arith.constant 0.000000e+00 : f32
    %6 = vector.broadcast %cst_5 : f32 to vector<16x128xf32>
    %7 = arith.maximumf %5, %6 : vector<16x128xf32>
    %8 = arith.truncf %7 : vector<16x128xf32> to vector<16x128xbf16>
    %c0_6 = arith.constant 0 : index
    %c0_7 = arith.constant 0 : index
    %9 = vector.load %arg4[%c0_6, %c0_7] : memref<128x512xbf16, #tpu.memory_space<vmem>>, vector<128x512xbf16>
    %cst_8 = arith.constant dense<0.000000e+00> : vector<16x512xf32>
    %10 = tpu.matmul %8, %9, %cst_8 {dimension_numbers = #tpu.dot_dimension_numbers<[1], [0], [0], [1], [0, 0, 1, 1], [], []>} : vector<16x128xbf16>, vector<128x512xbf16>, vector<16x512xf32> -> vector<16x512xf32>
    %c0_9 = arith.constant 0 : index
    %c0_10 = arith.constant 0 : index
    %11 = vector.load %arg5[%c0_9, %c0_10] : memref<1x512xf32, #tpu.memory_space<vmem>>, vector<1x512xf32>
    %12 = vector.broadcast %11 : vector<1x512xf32> to vector<16x512xf32>
    %13 = arith.addf %10, %12 : vector<16x512xf32>
    %cst_11 = arith.constant 0.000000e+00 : f32
    %14 = vector.broadcast %cst_11 : f32 to vector<16x512xf32>
    %15 = arith.maximumf %13, %14 : vector<16x512xf32>
    %16 = arith.truncf %15 : vector<16x512xf32> to vector<16x512xbf16>
    %c0_12 = arith.constant 0 : index
    %c0_13 = arith.constant 0 : index
    %17 = vector.load %arg6[%c0_12, %c0_13] : memref<512x128xbf16, #tpu.memory_space<vmem>>, vector<512x128xbf16>
    %cst_14 = arith.constant dense<0.000000e+00> : vector<16x128xf32>
    %18 = tpu.matmul %16, %17, %cst_14 {dimension_numbers = #tpu.dot_dimension_numbers<[1], [0], [0], [1], [0, 0, 1, 1], [], []>} : vector<16x512xbf16>, vector<512x128xbf16>, vector<16x128xf32> -> vector<16x128xf32>
    %c0_15 = arith.constant 0 : index
    %c0_16 = arith.constant 0 : index
    %19 = vector.load %arg7[%c0_15, %c0_16] : memref<1x128xf32, #tpu.memory_space<vmem>>, vector<1x128xf32>
    %20 = vector.broadcast %19 : vector<1x128xf32> to vector<16x128xf32>
    %21 = arith.addf %18, %20 : vector<16x128xf32>
    %c0_17 = arith.constant 0 : index
    %c0_18 = arith.constant 0 : index
    %22 = vector.load %arg8[%c0_17, %c0_18] : memref<16x128xf32, #tpu.memory_space<vmem>>, vector<16x128xf32>
    tpu.vector_store %arg8[%c0_17, %c0_18], %21 {strides = array<i32>} : memref<16x128xf32, #tpu.memory_space<vmem>>, vector<16x128xf32>,
    return
  }
  func.func @transform_0(%arg0: i32) -> (i32, i32) {
    %c0_i32 = arith.constant 0 : i32
    %c0_i32_0 = arith.constant 0 : i32
    return %arg0, %c0_i32 : i32, i32
  }
  func.func @transform_1(%arg0: i32) -> (i32, i32) {
    %c0_i32 = arith.constant 0 : i32
    %c0_i32_0 = arith.constant 0 : i32
    %c0_i32_1 = arith.constant 0 : i32
    return %c0_i32, %c0_i32_0 : i32, i32
  }
  func.func @transform_2(%arg0: i32) -> (i32, i32) {
    %c0_i32 = arith.constant 0 : i32
    %c0_i32_0 = arith.constant 0 : i32
    %c0_i32_1 = arith.constant 0 : i32
    return %c0_i32, %c0_i32_0 : i32, i32
  }
  func.func @transform_3(%arg0: i32) -> (i32, i32) {
    %c0_i32 = arith.constant 0 : i32
    %c0_i32_0 = arith.constant 0 : i32
    %c0_i32_1 = arith.constant 0 : i32
    return %c0_i32, %c0_i32_0 : i32, i32
  }
  func.func @transform_4(%arg0: i32) -> (i32, i32) {
    %c0_i32 = arith.constant 0 : i32
    %c0_i32_0 = arith.constant 0 : i32
    %c0_i32_1 = arith.constant 0 : i32
    return %c0_i32, %c0_i32_0 : i32, i32
  }
  func.func @transform_5(%arg0: i32) -> (i32, i32) {
    %c0_i32 = arith.constant 0 : i32
    %c0_i32_0 = arith.constant 0 : i32
    %c0_i32_1 = arith.constant 0 : i32
    return %c0_i32, %c0_i32_0 : i32, i32
  }
  func.func @transform_6(%arg0: i32) -> (i32, i32) {
    %c0_i32 = arith.constant 0 : i32
    %c0_i32_0 = arith.constant 0 : i32
    %c0_i32_1 = arith.constant 0 : i32
    return %c0_i32, %c0_i32_0 : i32, i32
  }
  func.func @transform_7(%arg0: i32) -> (i32, i32) {
    %c0_i32 = arith.constant 0 : i32
    %c0_i32_0 = arith.constant 0 : i32
    return %arg0, %c0_i32 : i32, i32
  }
}

</mosaic_0001>

<bundles_post_ra>
// kernel: dqn_forward.3
= control target key start
LH: loop header
LB: loop body
LE: loop exit
PB: predicated region body
PF: predicated region fallthrough
CT: control target
= control target key end

     0   :  { %s727_s12 = smov 0   ;;  %s809_s0 = inlined_call_operand.vmem [shape: bf16[128,256], index: 0, kind: input, shape index: {}]   ;;  %s810_s1 = inlined_call_operand.vmem [shape: bf16[256,128], index: 1, kind: input, shape index: {}]   ;;  %s811_s2 = inlined_call_operand.vmem [shape: f32[1,128], index: 2, kind: input, shape index: {}]   ;;  %s812_s3 = inlined_call_operand.vmem [shape: bf16[128,128], index: 3, kind: output, shape index: {}]  }
   0x1 LB: > { %s530_s13 = sadd.s32 4294967295, %s705_s12   ;;  %p534_p0 = scmp.ge.s32.totalorder %s705_s12, 1  ;;  %s705_s12 = sphi %s727_s12, %s13_s12  }
   0x2   : > { %p139_p1 = scmp.lt.s32.totalorder %s705_s12, 3 }
   0x4   : > { %p140_p2 = pnand %p534_p0, %p139_p1 }
   0x5   : > { %v671_v0 = vld [vmem:[%s810_s1 + $0x40] sm:$0xff] (!%p140_p2)   ;;  %s535_s16 = sshll.u32 (!%p140_p2), %s530_s13, 3  ;;  %v673_v2 = vld [vmem:[%s810_s1 + $0x48] sm:$0xff] (!%p140_p2)   ;;  %v675_v4 = vld [vmem:[%s810_s1 + $0x50] sm:$0xff] (!%p140_p2)  }
   0x6   : > { %143 = sbr.rel (%p140_p2) target bundleno = 271 (0x10f), region = 32  ;;  %v672_v1 = vld [vmem:[%s810_s1] sm:$0xff] (!%p140_p2)   ;;  %607 = vmatprep.subr.bf16.mxu0 (!%p140_p2), %v671_v0  ;;  %647 = vmatprep.subr.bf16.mxu1 (!%p140_p2), %v671_v0  ;;  %v674_v3 = vld [vmem:[%s810_s1 + $0x8] sm:$0xff] (!%p140_p2)   ;;  %p165_p3 = scmp.lt.s32.totalorder (!%p140_p2), %s535_s16, 15  ;;  %v676_v5 = vld [vmem:[%s810_s1 + $0x10] sm:$0xff] (!%p140_p2)  }
   0x7   : > { %608 = vmatpush3.bf16.msra.mxu0 (!%p140_p2), %v672_v1  ;;  %655 = vmatpush3.bf16.msra.mxu1 (!%p140_p2), %v672_v1  ;;  %v677_v6 = vld [vmem:[%s810_s1 + $0x58] sm:$0xff] (!%p140_p2)   ;;  %v679_v8 = vld [vmem:[%s810_s1 + $0x60] sm:$0xff] (!%p140_p2)   ;;  %v681_v10 = vld [vmem:[%s810_s1 + $0x68] sm:$0xff] (!%p140_p2)  }
   0x8   : > { %609 = vmatprep.subr.bf16.mxu0 (!%p140_p2), %v673_v2  ;;  %648 = vmatprep.subr.bf16.mxu1 (!%p140_p2), %v673_v2  ;;  %v678_v7 = vld [vmem:[%s810_s1 + $0x18] sm:$0xff] (!%p140_p2)   ;;  %v680_v9 = vld [vmem:[%s810_s1 + $0x20] sm:$0xff] (!%p140_p2)   ;;  %v682_v13 = vld [vmem:[%s810_s1 + $0x28] sm:$0xff] (!%p140_p2)  }
   0x9   : > { %v683_v14 = vld [vmem:[%s810_s1 + $0x70] sm:$0xff] (!%p140_p2)   ;;  %v685_v16 = vld [vmem:[%s810_s1 + $0x78] sm:$0xff] (!%p140_p2)   ;;  %v540_v26 = vld [vmem:[%s811_s2] ss:$0 sm:$0xff] (!%p140_p2) }
   0xa   : > { %v684_v15 = vld [vmem:[%s810_s1 + $0x30] sm:$0xff] (!%p140_p2)   ;;  %v686_v17 = vld [vmem:[%s810_s1 + $0x38] sm:$0xff] (!%p140_p2)  }
   0xb   : > { %610 = vmatpush3.bf16.msra.mxu0 (!%p140_p2), %v674_v3  ;;  %656 = vmatpush3.bf16.msra.mxu1 (!%p140_p2), %v674_v3 }
   0xc   : > { %611 = vmatprep.subr.bf16.mxu0 (!%p140_p2), %v675_v4  ;;  %649 = vmatprep.subr.bf16.mxu1 (!%p140_p2), %v675_v4 }
   0xd   : > { %s814_s16 = smov (!%p165_p3, %s535_s16), 15 }
   0xe   : > { %s575_s4 = sshll.u32 %s814_s16, 3  ;;  %s539_s28 = sshll.u32 %s814_s16, 2 }
   0xf   : > { %612 = vmatpush3.bf16.msra.mxu0 %v676_v5  ;;  %657 = vmatpush3.bf16.msra.mxu1 %v676_v5  ;;  %s768_s9 = scalar_lea.vmem %s809_s0, %s575_s4  ;;  %s175_s4 = scalar_lea.vmem %s812_s3, %s539_s28 }
  0x10   : > { %613 = vmatprep.subr.bf16.mxu0 %v677_v6  ;;  %650 = vmatprep.subr.bf16.mxu1 %v677_v6  ;;  %v689_v11 = vld [vmem:[%s768_s9 + $0x4] ss:$8 sps:$4 sm:$0xff]   ;;  %v687_v18 = vld [vmem:[%s768_s9] ss:$8 sps:$4 sm:$0xff]   ;;  %v693_v20 = vld [vmem:[%s768_s9 + $0x14] ss:$8 sps:$4 sm:$0xff]  }
  0x11   : > { %v692_v12 = vld [vmem:[%s768_s9 + $0x24] ss:$8 sps:$4 sm:$0xff]   ;;  %393 = vmatprep.mubr.bf16.mxu0 %v689_v11  ;;  %v690_v19 = vld [vmem:[%s768_s9 + $0x20] ss:$8 sps:$4 sm:$0xff]   ;;  %v695_v21 = vld [vmem:[%s768_s9 + $0x34] ss:$8 sps:$4 sm:$0xff]  }
  0x12   : > { %409 = vmatprep.mubr.bf16.mxu1 %v692_v12  ;;  %v697_v22 = vld [vmem:[%s768_s9 + $0x10] ss:$8 sps:$4 sm:$0xff]  }
  0x13   : > { %614 = vmatpush3.bf16.msra.mxu0 %v678_v7  ;;  %658 = vmatpush3.bf16.msra.mxu1 %v678_v7  ;;  %v698_v23 = vld [vmem:[%s768_s9 + $0x30] ss:$8 sps:$4 sm:$0xff]  }
  0x14   : > { %615 = vmatprep.subr.bf16.mxu0 %v679_v8  ;;  %651 = vmatprep.subr.bf16.mxu1 %v679_v8 }
  0x17   : > { %616 = vmatpush3.bf16.msra.mxu0 %v680_v9  ;;  %659 = vmatpush3.bf16.msra.mxu1 %v680_v9 }
  0x18   : > { %617 = vmatprep.subr.bf16.mxu0 %v681_v10  ;;  %652 = vmatprep.subr.bf16.mxu1 %v681_v10 }
  0x1b   : > { %618 = vmatpush3.bf16.msra.mxu0 %v682_v13  ;;  %660 = vmatpush3.bf16.msra.mxu1 %v682_v13 }
  0x1c   : > { %619 = vmatprep.subr.bf16.mxu0 %v683_v14  ;;  %653 = vmatprep.subr.bf16.mxu1 %v683_v14 }
  0x1f   : > { %620 = vmatpush3.bf16.msra.mxu0 %v684_v15  ;;  %661 = vmatpush3.bf16.msra.mxu1 %v684_v15 }
  0x20   : > { %621 = vmatprep.subr.bf16.mxu0 %v685_v16  ;;  %654 = vmatprep.subr.bf16.mxu1 %v685_v16 }
  0x23   : > { %622 = vmatpush3.bf16.msra.mxu0 %v686_v17  ;;  %662 = vmatpush3.bf16.msra.mxu1 %v686_v17 }
  0x26   : > { %394 = vmatmul.mubr.bf16.vlgmr.msra.gmra.mrb[0].mxu0 %v687_v18  ;;  %410 = vmatmul.mubr.bf16.vlgmr.msra.gmra.mrb[0].mxu1 %v690_v19 }
  0x27   : > { %401 = vmatprep.mubr.bf16.mxu0 %v693_v20  ;;  %417 = vmatprep.mubr.bf16.mxu1 %v695_v21 }
  0x2e   : > { %402 = vmatmul.mubr.bf16.gmra.mrb[4].mxu0 %v697_v22  ;;  %418 = vmatmul.mubr.bf16.gmra.mrb[4].mxu1 %v698_v23 }
  0xf9   : > { %v623_v24 = vpop.f32.mrb[0].mxu0  ;;  %v635_v25 = vpop.f32.mrb[0].mxu1 }
  0xfa   : > { %v624_v27 = vpop.f32.mrb[1].mxu0  ;;  %v636_v28 = vpop.f32.mrb[1].mxu1 }
  0xfb   : > { %v625_v29 = vadd.f32 %v624_v27, %v623_v24  ;;  %v637_v30 = vadd.f32 %v636_v28, %v635_v25  ;;  %v626_v31 = vpop.f32.mrb[2].mxu0  ;;  %v638_v32 = vpop.f32.mrb[2].mxu1 }
  0xfc   : > { %v627_v33 = vpop.f32.mrb[3].mxu0  ;;  %v639_v34 = vpop.f32.mrb[3].mxu1 }
  0xfd   : > { %v396_v35 = vadd.f32 %v625_v29, %v540_v26  ;;  %v412_v36 = vadd.f32 %v637_v30, %v540_v26  ;;  %v628_v37 = vadd.f32 %v627_v33, %v626_v31  ;;  %v640_v38 = vadd.f32 %v639_v34, %v638_v32 }
  0xff   : > { %v399_v39 = vadd.f32 %v628_v37, %v540_v26  ;;  %v415_v40 = vadd.f32 %v640_v38, %v540_v26  ;;  %v426_v41 = vmax.f32 %v396_v35, 0.0  ;;  %v430_v42 = vmax.f32 %v412_v36, 0.0 }
 0x101   : > { %v427_v43 = vmax.f32 %v399_v39, 0.0  ;;  %v431_v44 = vmax.f32 %v415_v40, 0.0  ;;  %v629_v45 = vpop.f32.mrb[4].mxu0  ;;  %v641_v46 = vpop.f32.mrb[4].mxu1 }
 0x102   : > { %v630_v47 = vpop.f32.mrb[5].mxu0  ;;  %v642_v48 = vpop.f32.mrb[5].mxu1 }
 0x103   : > { %v587_v49 = vpack.c.bf16 %v427_v43, %v426_v41  ;;  %v597_v50 = vpack.c.bf16 %v431_v44, %v430_v42  ;;  %v631_v51 = vadd.f32 %v630_v47, %v629_v45  ;;  %v643_v52 = vadd.f32 %v642_v48, %v641_v46  ;;  %v632_v53 = vpop.f32.mrb[6].mxu0  ;;  %v644_v54 = vpop.f32.mrb[6].mxu1 }
 0x104   : > { %v633_v55 = vpop.f32.mrb[7].mxu0  ;;  %v645_v56 = vpop.f32.mrb[7].mxu1 }
 0x105   : > { %588 = vst [vmem:[%s175_s4] sm:$0xff] %v587_v49   ;;  %605 = vst [vmem:[%s175_s4 + $0x10] sm:$0xff] %v597_v50   ;;  %v404_v57 = vadd.f32 %v631_v51, %v540_v26  ;;  %v420_v58 = vadd.f32 %v643_v52, %v540_v26  ;;  %v634_v59 = vadd.f32 %v633_v55, %v632_v53 }
 0x106   : > { %v646_v60 = vadd.f32 %v645_v56, %v644_v54 }
 0x107   : > { %v407_v61 = vadd.f32 %v634_v59, %v540_v26  ;;  %v428_v63 = vmax.f32 %v404_v57, 0.0  ;;  %v432_v0 = vmax.f32 %v420_v58, 0.0 }
 0x108   : > { %v423_v62 = vadd.f32 %v646_v60, %v540_v26 }
 0x109   : > { %v429_v1 = vmax.f32 %v407_v61, 0.0 }
 0x10a   : > { %v433_v2 = vmax.f32 %v423_v62, 0.0 }
 0x10b   : > { %v592_v3 = vpack.c.bf16 %v429_v1, %v428_v63 }
 0x10c   : > { %v602_v4 = vpack.c.bf16 %v433_v2, %v432_v0 }
 0x10d   : > { %604 = vst [vmem:[%s175_s4 + $0x8] sm:$0xff] %v592_v3  }
 0x10e   : > { %606 = vst [vmem:[%s175_s4 + $0x18] sm:$0xff] %v602_v4  }
 0x10f PF: > { %s13_s12 = sadd.s32 1, %s705_s12  }
 0x110   : > { %p10_p4 = scmp.ge.s32.totalorder %s13_s12, 4  }
 0x112   :  { %12 = sbr.rel (!%p10_p4) target bundleno = 1 (0x1), region = 62 }

// kernel: dqn_forward.4
= control target key start
LH: loop header
LB: loop body
LE: loop exit
PB: predicated region body
PF: predicated region fallthrough
CT: control target
= control target key end

     0   :  { %s2208_s12 = smov 0   ;;  %s2636_s0 = inlined_call_operand.vmem [shape: bf16[32,2048], index: 0, kind: input, shape index: {}]   ;;  %s2637_s1 = inlined_call_operand.vmem [shape: bf16[2048,128], index: 1, kind: input, shape index: {}]   ;;  %s2638_s2 = inlined_call_operand.vmem [shape: f32[1,128], index: 2, kind: input, shape index: {}]   ;;  %s2639_s3 = inlined_call_operand.vmem [shape: bf16[32,128], index: 3, kind: output, shape index: {}]  }
   0x1 LB: > { %s1701_s13 = sadd.s32 4294967295, %s2186_s12   ;;  %p1705_p0 = scmp.ge.s32.totalorder %s2186_s12, 1  ;;  %s2186_s12 = sphi %s2208_s12, %s13_s12  }
   0x2   : > { %p139_p1 = scmp.lt.s32.totalorder %s2186_s12, 3 }
   0x4   : > { %p140_p2 = pnand %p1705_p0, %p139_p1 }
   0x5   : > { %v2052_v0 = vld [vmem:[%s2637_s1 + $0x40] sm:$0xff] (!%p140_p2)   ;;  %v2056_v4 = vld [vmem:[%s2637_s1 + $0x48] sm:$0xff] (!%p140_p2)   ;;  %v2060_v8 = vld [vmem:[%s2637_s1 + $0x50] sm:$0xff] (!%p140_p2)   ;;  %s1706_s21 = sshll.u32 (!%p140_p2), %s1701_s13, 1 }
   0x6   : > { %143 = sbr.rel (%p140_p2) target bundleno = 361 (0x169), region = 32  ;;  %v2053_v1 = vld [vmem:[%s2637_s1 + $0xc0] sm:$0xff] (!%p140_p2)   ;;  %1868 = vmatprep.subr.bf16.mxu0 (!%p140_p2), %v2052_v0  ;;  %v2057_v5 = vld [vmem:[%s2637_s1 + $0xc8] sm:$0xff] (!%p140_p2)   ;;  %v2061_v9 = vld [vmem:[%s2637_s1 + $0xd0] sm:$0xff] (!%p140_p2)   ;;  %p165_p3 = scmp.lt.s32.totalorder (!%p140_p2), %s1706_s21, 3 }
   0x7   : > { %v2054_v2 = vld [vmem:[%s2637_s1] sm:$0xff] (!%p140_p2)   ;;  %1890 = vmatprep.subr.bf16.mxu1 (!%p140_p2), %v2053_v1  ;;  %v2058_v6 = vld [vmem:[%s2637_s1 + $0x8] sm:$0xff] (!%p140_p2)   ;;  %v2062_v10 = vld [vmem:[%s2637_s1 + $0x10] sm:$0xff] (!%p140_p2)  }
   0x8   : > { %v2055_v3 = vld [vmem:[%s2637_s1 + $0x80] sm:$0xff] (!%p140_p2)   ;;  %1869 = vmatpush3.bf16.msra.mxu0 (!%p140_p2), %v2054_v2  ;;  %v2059_v7 = vld [vmem:[%s2637_s1 + $0x88] sm:$0xff] (!%p140_p2)   ;;  %v2063_v11 = vld [vmem:[%s2637_s1 + $0x90] sm:$0xff] (!%p140_p2)  }
   0x9   : > { %1891 = vmatpush3.bf16.msra.mxu1 (!%p140_p2), %v2055_v3  ;;  %1870 = vmatprep.subr.bf16.mxu0 (!%p140_p2), %v2056_v4  ;;  %v2064_v12 = vld [vmem:[%s2637_s1 + $0x58] sm:$0xff] (!%p140_p2)   ;;  %v2068_v16 = vld [vmem:[%s2637_s1 + $0x60] sm:$0xff] (!%p140_p2)   ;;  %v2072_v20 = vld [vmem:[%s2637_s1 + $0x68] sm:$0xff] (!%p140_p2)  }
   0xa   : > { %1892 = vmatprep.subr.bf16.mxu1 (!%p140_p2), %v2057_v5  ;;  %v2065_v13 = vld [vmem:[%s2637_s1 + $0xd8] sm:$0xff] (!%p140_p2)   ;;  %v2069_v17 = vld [vmem:[%s2637_s1 + $0xe0] sm:$0xff] (!%p140_p2)   ;;  %v2073_v21 = vld [vmem:[%s2637_s1 + $0xe8] sm:$0xff] (!%p140_p2)  }
   0xb   : > { %v2066_v14 = vld [vmem:[%s2637_s1 + $0x18] sm:$0xff] (!%p140_p2)   ;;  %v2070_v18 = vld [vmem:[%s2637_s1 + $0x20] sm:$0xff] (!%p140_p2)   ;;  %v2074_v22 = vld [vmem:[%s2637_s1 + $0x28] sm:$0xff] (!%p140_p2)  }
   0xc   : > { %1871 = vmatpush3.bf16.msra.mxu0 (!%p140_p2), %v2058_v6  ;;  %v2067_v15 = vld [vmem:[%s2637_s1 + $0x98] sm:$0xff] (!%p140_p2)   ;;  %v2071_v19 = vld [vmem:[%s2637_s1 + $0xa0] sm:$0xff] (!%p140_p2)   ;;  %v2075_v23 = vld [vmem:[%s2637_s1 + $0xa8] sm:$0xff] (!%p140_p2)  }
   0xd   : > { %1893 = vmatpush3.bf16.msra.mxu1 %v2059_v7  ;;  %1872 = vmatprep.subr.bf16.mxu0 %v2060_v8  ;;  %s2641_s21 = smov (!%p165_p3, %s1706_s21), 3  ;;  %v2076_v24 = vld [vmem:[%s2637_s1 + $0x70] sm:$0xff]   ;;  %v2080_v28 = vld [vmem:[%s2637_s1 + $0x78] sm:$0xff]   ;;  %v2084_v40 = vld [vmem:[%s2637_s1 + $0x140] sm:$0xff]  }
   0xe   : > { %1894 = vmatprep.subr.bf16.mxu1 %v2061_v9  ;;  %v2077_v25 = vld [vmem:[%s2637_s1 + $0xf0] sm:$0xff]   ;;  %s1860_s18 = sshll.u32 %s2641_s21, 6  ;;  %v2081_v29 = vld [vmem:[%s2637_s1 + $0xf8] sm:$0xff]   ;;  %v2085_v41 = vld [vmem:[%s2637_s1 + $0x1c0] sm:$0xff]  }
   0xf   : > { %v2078_v26 = vld [vmem:[%s2637_s1 + $0x30] sm:$0xff]   ;;  %s2314_s28 = scalar_lea.vmem %s2636_s0, %s1860_s18  ;;  %v2082_v30 = vld [vmem:[%s2637_s1 + $0x38] sm:$0xff]   ;;  %v2086_v42 = vld [vmem:[%s2637_s1 + $0x100] sm:$0xff]  }
  0x10   : > { %1873 = vmatpush3.bf16.msra.mxu0 %v2062_v10  ;;  %v2079_v27 = vld [vmem:[%s2637_s1 + $0xb0] sm:$0xff]   ;;  %v2083_v31 = vld [vmem:[%s2637_s1 + $0xb8] sm:$0xff]   ;;  %v178_v32 = vld [vmem:[%s2314_s28] sm:$0xff] }
  0x11   : > { %1895 = vmatpush3.bf16.msra.mxu1 %v2063_v11  ;;  %1874 = vmatprep.subr.bf16.mxu0 %v2064_v12  ;;  %v186_v33 = vld [vmem:[%s2314_s28 + $0x40] sm:$0xff]  ;;  %v179_v34 = vld [vmem:[%s2314_s28 + $0x8] sm:$0xff]  ;;  %v2092_v48 = vld [vmem:[%s2637_s1 + $0x150] sm:$0xff]  }
  0x12   : > { %1896 = vmatprep.subr.bf16.mxu1 %v2065_v13  ;;  %v1712_v35 = vcombine.low %v178_v32, %v186_v33  ;;  %v1713_v36 = vcombine.high %v178_v32, %v186_v33  ;;  %v187_v37 = vld [vmem:[%s2314_s28 + $0x48] sm:$0xff]  ;;  %v2087_v43 = vld [vmem:[%s2637_s1 + $0x180] sm:$0xff]   ;;  %v2093_v49 = vld [vmem:[%s2637_s1 + $0x1d0] sm:$0xff]  }
  0x13   : > { %v1714_v38 = vcombine.low %v179_v34, %v187_v37  ;;  %v1715_v39 = vcombine.high %v179_v34, %v187_v37  ;;  %v2088_v44 = vld [vmem:[%s2637_s1 + $0x148] sm:$0xff]   ;;  %v2094_v50 = vld [vmem:[%s2637_s1 + $0x110] sm:$0xff]   ;;  %v2096_v52 = vld [vmem:[%s2637_s1 + $0x158] sm:$0xff]  }
  0x14   : > { %1875 = vmatpush3.bf16.msra.mxu0 %v2066_v14  ;;  %1337 = vmatprep.mubr.bf16.mxu0 %v1713_v36  ;;  %v2089_v45 = vld [vmem:[%s2637_s1 + $0x1c8] sm:$0xff]   ;;  %v2095_v51 = vld [vmem:[%s2637_s1 + $0x190] sm:$0xff]   ;;  %v2097_v53 = vld [vmem:[%s2637_s1 + $0x1d8] sm:$0xff]  }
  0x15   : > { %1897 = vmatpush3.bf16.msra.mxu1 %v2067_v15  ;;  %1876 = vmatprep.subr.bf16.mxu0 %v2068_v16  ;;  %v2090_v46 = vld [vmem:[%s2637_s1 + $0x108] sm:$0xff]   ;;  %v2098_v54 = vld [vmem:[%s2637_s1 + $0x118] sm:$0xff]   ;;  %v2100_v56 = vld [vmem:[%s2637_s1 + $0x160] sm:$0xff]  }
  0x16   : > { %1898 = vmatprep.subr.bf16.mxu1 %v2069_v17  ;;  %1378 = vmatprep.mubr.bf16.mxu1 %v1715_v39  ;;  %v2091_v47 = vld [vmem:[%s2637_s1 + $0x188] sm:$0xff]   ;;  %v2099_v55 = vld [vmem:[%s2637_s1 + $0x198] sm:$0xff]   ;;  %v2101_v57 = vld [vmem:[%s2637_s1 + $0x1e0] sm:$0xff]  }
  0x17   : > { %v2102_v58 = vld [vmem:[%s2637_s1 + $0x120] sm:$0xff]   ;;  %v2104_v60 = vld [vmem:[%s2637_s1 + $0x168] sm:$0xff]   ;;  %v2108_v0 = vld [vmem:[%s2637_s1 + $0x170] sm:$0xff]  }
  0x18   : > { %1877 = vmatpush3.bf16.msra.mxu0 %v2070_v18  ;;  %v2103_v59 = vld [vmem:[%s2637_s1 + $0x1a0] sm:$0xff]   ;;  %v2105_v61 = vld [vmem:[%s2637_s1 + $0x1e8] sm:$0xff]   ;;  %v2109_v1 = vld [vmem:[%s2637_s1 + $0x1f0] sm:$0xff]  }
  0x19   : > { %1899 = vmatpush3.bf16.msra.mxu1 %v2071_v19  ;;  %1878 = vmatprep.subr.bf16.mxu0 %v2072_v20  ;;  %v2106_v62 = vld [vmem:[%s2637_s1 + $0x128] sm:$0xff]   ;;  %v2110_v2 = vld [vmem:[%s2637_s1 + $0x130] sm:$0xff]   ;;  %v2112_v4 = vld [vmem:[%s2637_s1 + $0x178] sm:$0xff]  }
  0x1a   : > { %1900 = vmatprep.subr.bf16.mxu1 %v2073_v21  ;;  %v2107_v63 = vld [vmem:[%s2637_s1 + $0x1a8] sm:$0xff]   ;;  %v2111_v3 = vld [vmem:[%s2637_s1 + $0x1b0] sm:$0xff]   ;;  %v2113_v5 = vld [vmem:[%s2637_s1 + $0x1f8] sm:$0xff]  }
  0x1b   : > { %v2114_v6 = vld [vmem:[%s2637_s1 + $0x138] sm:$0xff]   ;;  %v180_v8 = vld [vmem:[%s2314_s28 + $0x10] sm:$0xff]  ;;  %v2116_v16 = vld [vmem:[%s2637_s1 + $0x240] sm:$0xff]  }
  0x1c   : > { %1879 = vmatpush3.bf16.msra.mxu0 %v2074_v22  ;;  %v2115_v7 = vld [vmem:[%s2637_s1 + $0x1b8] sm:$0xff]   ;;  %v188_v9 = vld [vmem:[%s2314_s28 + $0x50] sm:$0xff]  ;;  %v2117_v17 = vld [vmem:[%s2637_s1 + $0x2c0] sm:$0xff]  }
  0x1d   : > { %1901 = vmatpush3.bf16.msra.mxu1 %v2075_v23  ;;  %1880 = vmatprep.subr.bf16.mxu0 %v2076_v24  ;;  %v1716_v10 = vcombine.low %v180_v8, %v188_v9  ;;  %v1717_v11 = vcombine.high %v180_v8, %v188_v9  ;;  %v181_v12 = vld [vmem:[%s2314_s28 + $0x18] sm:$0xff]  ;;  %v2118_v18 = vld [vmem:[%s2637_s1 + $0x200] sm:$0xff]   ;;  %v2120_v20 = vld [vmem:[%s2637_s1 + $0x248] sm:$0xff]  }
  0x1e   : > { %1902 = vmatprep.subr.bf16.mxu1 %v2077_v25  ;;  %v189_v13 = vld [vmem:[%s2314_s28 + $0x58] sm:$0xff]  ;;  %v2119_v19 = vld [vmem:[%s2637_s1 + $0x280] sm:$0xff]   ;;  %v2121_v21 = vld [vmem:[%s2637_s1 + $0x2c8] sm:$0xff]  }
  0x1f   : > { %v1718_v14 = vcombine.low %v181_v12, %v189_v13  ;;  %v1719_v15 = vcombine.high %v181_v12, %v189_v13  ;;  %v2122_v22 = vld [vmem:[%s2637_s1 + $0x208] sm:$0xff]   ;;  %v2124_v24 = vld [vmem:[%s2637_s1 + $0x250] sm:$0xff]   ;;  %v2132_v32 = vld [vmem:[%s2637_s1 + $0x260] sm:$0xff]  }
  0x20   : > { %1881 = vmatpush3.bf16.msra.mxu0 %v2078_v26  ;;  %v2123_v23 = vld [vmem:[%s2637_s1 + $0x288] sm:$0xff]   ;;  %v2125_v25 = vld [vmem:[%s2637_s1 + $0x2d0] sm:$0xff]   ;;  %v2133_v33 = vld [vmem:[%s2637_s1 + $0x2e0] sm:$0xff]  }
  0x21   : > { %1903 = vmatpush3.bf16.msra.mxu1 %v2079_v27  ;;  %1882 = vmatprep.subr.bf16.mxu0 %v2080_v28  ;;  %v2126_v26 = vld [vmem:[%s2637_s1 + $0x210] sm:$0xff]   ;;  %v2128_v28 = vld [vmem:[%s2637_s1 + $0x258] sm:$0xff]   ;;  %v2134_v34 = vld [vmem:[%s2637_s1 + $0x220] sm:$0xff]  }
  0x22   : > { %1904 = vmatprep.subr.bf16.mxu1 %v2081_v29  ;;  %v2127_v27 = vld [vmem:[%s2637_s1 + $0x290] sm:$0xff]   ;;  %v2129_v29 = vld [vmem:[%s2637_s1 + $0x2d8] sm:$0xff]   ;;  %v2136_v36 = vld [vmem:[%s2637_s1 + $0x268] sm:$0xff]  }
  0x23   : > { %v2137_v37 = vld [vmem:[%s2637_s1 + $0x2e8] sm:$0xff]   ;;  %v2164_v8 = vld [vmem:[%s2637_s1 + $0x360] sm:$0xff]  }
  0x24   : > { %1883 = vmatpush3.bf16.msra.mxu0 %v2082_v30  ;;  %v2130_v30 = vld [vmem:[%s2637_s1 + $0x218] sm:$0xff]   ;;  %v2139_v39 = vld [vmem:[%s2637_s1 + $0x2a8] sm:$0xff]   ;;  %v2165_v9 = vld [vmem:[%s2637_s1 + $0x3e0] sm:$0xff]  }
  0x25   : > { %1905 = vmatpush3.bf16.msra.mxu1 %v2083_v31  ;;  %1912 = vmatprep.subr.bf16.mxu0 %v2084_v40  ;;  %v2131_v31 = vld [vmem:[%s2637_s1 + $0x298] sm:$0xff]   ;;  %v2140_v40 = vld [vmem:[%s2637_s1 + $0x270] sm:$0xff]   ;;  %v2168_v12 = vld [vmem:[%s2637_s1 + $0x368] sm:$0xff]  }
  0x26   : > { %1934 = vmatprep.subr.bf16.mxu1 %v2085_v41  ;;  %v2141_v41 = vld [vmem:[%s2637_s1 + $0x2f0] sm:$0xff]   ;;  %v2169_v13 = vld [vmem:[%s2637_s1 + $0x3e8] sm:$0xff]  }
  0x27   : > { %1338 = vmatmul.mubr.bf16.vlgmr.msra.gmra.mrb[0].mxu0 %v1712_v35  ;;  %v2135_v35 = vld [vmem:[%s2637_s1 + $0x2a0] sm:$0xff]  }
  0x28   : > { %1379 = vmatmul.mubr.bf16.vlgmr.msra.gmra.mrb[0].mxu1 %v1714_v38  ;;  %1913 = vmatpush3.bf16.msra.mxu0 %v2086_v42  ;;  %v2138_v38 = vld [vmem:[%s2637_s1 + $0x228] sm:$0xff]   ;;  %v2142_v42 = vld [vmem:[%s2637_s1 + $0x230] sm:$0xff]  }
  0x29   : > { %1935 = vmatpush3.bf16.msra.mxu1 %v2087_v43  ;;  %1914 = vmatprep.subr.bf16.mxu0 %v2088_v44  ;;  %v2143_v43 = vld [vmem:[%s2637_s1 + $0x2b0] sm:$0xff]   ;;  %v2144_v44 = vld [vmem:[%s2637_s1 + $0x278] sm:$0xff]  }
  0x2a   : > { %1936 = vmatprep.subr.bf16.mxu1 %v2089_v45  ;;  %1419 = vmatprep.mubr.bf16.mxu0 %v1717_v11  ;;  %v2145_v45 = vld [vmem:[%s2637_s1 + $0x2f8] sm:$0xff]   ;;  %v2167_v11 = vld [vmem:[%s2637_s1 + $0x3a0] sm:$0xff]  }
  0x2b   : > { %1460 = vmatprep.mubr.bf16.mxu1 %v1719_v15  ;;  %v2171_v15 = vld [vmem:[%s2637_s1 + $0x3a8] sm:$0xff]  }
  0x2c   : > { %1915 = vmatpush3.bf16.msra.mxu0 %v2090_v46  ;;  %v2146_v46 = vld [vmem:[%s2637_s1 + $0x238] sm:$0xff]  }
  0x2d   : > { %1937 = vmatpush3.bf16.msra.mxu1 %v2091_v47  ;;  %1916 = vmatprep.subr.bf16.mxu0 %v2092_v48  ;;  %v2147_v47 = vld [vmem:[%s2637_s1 + $0x2b8] sm:$0xff]   ;;  %v182_v48 = vld [vmem:[%s2314_s28 + $0x20] sm:$0xff] }
  0x2e   : > { %1938 = vmatprep.subr.bf16.mxu1 %v2093_v49  ;;  %v190_v49 = vld [vmem:[%s2314_s28 + $0x60] sm:$0xff] }
  0x30   : > { %1917 = vmatpush3.bf16.msra.mxu0 %v2094_v50  ;;  %v183_v50 = vld [vmem:[%s2314_s28 + $0x28] sm:$0xff] }
  0x31   : > { %1939 = vmatpush3.bf16.msra.mxu1 %v2095_v51  ;;  %1918 = vmatprep.subr.bf16.mxu0 %v2096_v52  ;;  %v191_v51 = vld [vmem:[%s2314_s28 + $0x68] sm:$0xff]  ;;  %v1720_v52 = vcombine.low %v182_v48, %v190_v49 }
  0x32   : > { %1940 = vmatprep.subr.bf16.mxu1 %v2097_v53  ;;  %v1721_v53 = vcombine.high %v182_v48, %v190_v49 }
  0x34   : > { %1919 = vmatpush3.bf16.msra.mxu0 %v2098_v54  ;;  %v1722_v54 = vcombine.low %v183_v50, %v191_v51 }
  0x35   : > { %1941 = vmatpush3.bf16.msra.mxu1 %v2099_v55  ;;  %1920 = vmatprep.subr.bf16.mxu0 %v2100_v56  ;;  %v1723_v55 = vcombine.high %v183_v50, %v191_v51  ;;  %v2148_v56 = vld [vmem:[%s2637_s1 + $0x340] sm:$0xff]  }
  0x36   : > { %1942 = vmatprep.subr.bf16.mxu1 %v2101_v57  ;;  %v2149_v57 = vld [vmem:[%s2637_s1 + $0x3c0] sm:$0xff]  }
  0x38   : > { %1921 = vmatpush3.bf16.msra.mxu0 %v2102_v58  ;;  %v2150_v58 = vld [vmem:[%s2637_s1 + $0x300] sm:$0xff]  }
  0x39   : > { %1943 = vmatpush3.bf16.msra.mxu1 %v2103_v59  ;;  %1922 = vmatprep.subr.bf16.mxu0 %v2104_v60  ;;  %v2151_v59 = vld [vmem:[%s2637_s1 + $0x380] sm:$0xff]   ;;  %v2152_v60 = vld [vmem:[%s2637_s1 + $0x348] sm:$0xff]  }
  0x3a   : > { %1944 = vmatprep.subr.bf16.mxu1 %v2105_v61  ;;  %v2153_v61 = vld [vmem:[%s2637_s1 + $0x3c8] sm:$0xff]  }
  0x3c   : > { %1923 = vmatpush3.bf16.msra.mxu0 %v2106_v62  ;;  %v2154_v62 = vld [vmem:[%s2637_s1 + $0x308] sm:$0xff]  }
  0x3d   : > { %1945 = vmatpush3.bf16.msra.mxu1 %v2107_v63  ;;  %1924 = vmatprep.subr.bf16.mxu0 %v2108_v0  ;;  %v2155_v63 = vld [vmem:[%s2637_s1 + $0x388] sm:$0xff]   ;;  %v2156_v0 = vld [vmem:[%s2637_s1 + $0x350] sm:$0xff]  }
  0x3e   : > { %1946 = vmatprep.subr.bf16.mxu1 %v2109_v1  ;;  %v2157_v1 = vld [vmem:[%s2637_s1 + $0x3d0] sm:$0xff]  }
  0x40   : > { %1925 = vmatpush3.bf16.msra.mxu0 %v2110_v2  ;;  %v2158_v2 = vld [vmem:[%s2637_s1 + $0x310] sm:$0xff]  }
  0x41   : > { %1947 = vmatpush3.bf16.msra.mxu1 %v2111_v3  ;;  %1926 = vmatprep.subr.bf16.mxu0 %v2112_v4  ;;  %v2159_v3 = vld [vmem:[%s2637_s1 + $0x390] sm:$0xff]   ;;  %v2160_v4 = vld [vmem:[%s2637_s1 + $0x358] sm:$0xff]  }
  0x42   : > { %1948 = vmatprep.subr.bf16.mxu1 %v2113_v5  ;;  %v2161_v5 = vld [vmem:[%s2637_s1 + $0x3d8] sm:$0xff]  }
  0x44   : > { %1927 = vmatpush3.bf16.msra.mxu0 %v2114_v6  ;;  %v2162_v6 = vld [vmem:[%s2637_s1 + $0x318] sm:$0xff]  }
  0x45   : > { %1949 = vmatpush3.bf16.msra.mxu1 %v2115_v7  ;;  %1956 = vmatprep.subr.bf16.mxu0 %v2116_v16  ;;  %v2163_v7 = vld [vmem:[%s2637_s1 + $0x398] sm:$0xff]   ;;  %v2172_v16 = vld [vmem:[%s2637_s1 + $0x370] sm:$0xff]  }
  0x46   : > { %1978 = vmatprep.subr.bf16.mxu1 %v2117_v17  ;;  %v2173_v17 = vld [vmem:[%s2637_s1 + $0x3f0] sm:$0xff]  }
  0x47   : > { %1420 = vmatmul.mubr.bf16.vlgmr.msra.gmra.mrb[4].mxu0 %v1716_v10  ;;  %v2166_v10 = vld [vmem:[%s2637_s1 + $0x320] sm:$0xff]  }
  0x48   : > { %1461 = vmatmul.mubr.bf16.vlgmr.msra.gmra.mrb[4].mxu1 %v1718_v14  ;;  %1957 = vmatpush3.bf16.msra.mxu0 %v2118_v18  ;;  %v2170_v14 = vld [vmem:[%s2637_s1 + $0x328] sm:$0xff]   ;;  %v2174_v18 = vld [vmem:[%s2637_s1 + $0x330] sm:$0xff]  }
  0x49   : > { %1979 = vmatpush3.bf16.msra.mxu1 %v2119_v19  ;;  %1958 = vmatprep.subr.bf16.mxu0 %v2120_v20  ;;  %v2175_v19 = vld [vmem:[%s2637_s1 + $0x3b0] sm:$0xff]   ;;  %v2176_v20 = vld [vmem:[%s2637_s1 + $0x378] sm:$0xff]  }
  0x4a   : > { %1980 = vmatprep.subr.bf16.mxu1 %v2121_v21  ;;  %1501 = vmatprep.mubr.bf16.mxu0 %v1721_v53  ;;  %v2177_v21 = vld [vmem:[%s2637_s1 + $0x3f8] sm:$0xff]  }
  0x4b   : > { %1542 = vmatprep.mubr.bf16.mxu1 %v1723_v55 }
  0x4c   : > { %1959 = vmatpush3.bf16.msra.mxu0 %v2122_v22  ;;  %v2178_v22 = vld [vmem:[%s2637_s1 + $0x338] sm:$0xff]  }
  0x4d   : > { %1981 = vmatpush3.bf16.msra.mxu1 %v2123_v23  ;;  %1960 = vmatprep.subr.bf16.mxu0 %v2124_v24  ;;  %v2179_v23 = vld [vmem:[%s2637_s1 + $0x3b8] sm:$0xff]   ;;  %v184_v24 = vld [vmem:[%s2314_s28 + $0x30] sm:$0xff] }
  0x4e   : > { %1982 = vmatprep.subr.bf16.mxu1 %v2125_v25  ;;  %v192_v25 = vld [vmem:[%s2314_s28 + $0x70] sm:$0xff] }
  0x50   : > { %1961 = vmatpush3.bf16.msra.mxu0 %v2126_v26  ;;  %v185_v26 = vld [vmem:[%s2314_s28 + $0x38] sm:$0xff] }
  0x51   : > { %1983 = vmatpush3.bf16.msra.mxu1 %v2127_v27  ;;  %1962 = vmatprep.subr.bf16.mxu0 %v2128_v28  ;;  %v1724_v27 = vcombine.low %v184_v24, %v192_v25  ;;  %v1725_v28 = vcombine.high %v184_v24, %v192_v25 }
  0x52   : > { %1984 = vmatprep.subr.bf16.mxu1 %v2129_v29  ;;  %v193_v29 = vld [vmem:[%s2314_s28 + $0x78] sm:$0xff]  ;;  %s1710_s28 = sshll.u32 %s2641_s21, 2 }
  0x53   : > { %s175_s9 = scalar_lea.vmem %s2639_s3, %s1710_s28 }
  0x54   : > { %1963 = vmatpush3.bf16.msra.mxu0 %v2130_v30  ;;  %v1726_v30 = vcombine.low %v185_v26, %v193_v29 }
  0x55   : > { %1985 = vmatpush3.bf16.msra.mxu1 %v2131_v31  ;;  %1964 = vmatprep.subr.bf16.mxu0 %v2132_v32  ;;  %v1727_v31 = vcombine.high %v185_v26, %v193_v29 }
  0x56   : > { %1986 = vmatprep.subr.bf16.mxu1 %v2133_v33 }
  0x58   : > { %1965 = vmatpush3.bf16.msra.mxu0 %v2134_v34  ;;  %v1711_v34 = vld [vmem:[%s2638_s2] ss:$0 sm:$0xff] }
  0x59   : > { %1987 = vmatpush3.bf16.msra.mxu1 %v2135_v35  ;;  %1966 = vmatprep.subr.bf16.mxu0 %v2136_v36 }
  0x5a   : > { %1988 = vmatprep.subr.bf16.mxu1 %v2137_v37 }
  0x5c   : > { %1967 = vmatpush3.bf16.msra.mxu0 %v2138_v38 }
  0x5d   : > { %1989 = vmatpush3.bf16.msra.mxu1 %v2139_v39  ;;  %1968 = vmatprep.subr.bf16.mxu0 %v2140_v40 }
  0x5e   : > { %1990 = vmatprep.subr.bf16.mxu1 %v2141_v41 }
  0x60   : > { %1969 = vmatpush3.bf16.msra.mxu0 %v2142_v42 }
  0x61   : > { %1991 = vmatpush3.bf16.msra.mxu1 %v2143_v43  ;;  %1970 = vmatprep.subr.bf16.mxu0 %v2144_v44 }
  0x62   : > { %1992 = vmatprep.subr.bf16.mxu1 %v2145_v45 }
  0x64   : > { %1971 = vmatpush3.bf16.msra.mxu0 %v2146_v46 }
  0x65   : > { %1993 = vmatpush3.bf16.msra.mxu1 %v2147_v47  ;;  %2000 = vmatprep.subr.bf16.mxu0 %v2148_v56 }
  0x66   : > { %2022 = vmatprep.subr.bf16.mxu1 %v2149_v57 }
  0x67   : > { %1502 = vmatmul.mubr.bf16.vlgmr.msra.gmra.mrb[8].mxu0 %v1720_v52 }
  0x68   : > { %1543 = vmatmul.mubr.bf16.vlgmr.msra.gmra.mrb[8].mxu1 %v1722_v54  ;;  %2001 = vmatpush3.bf16.msra.mxu0 %v2150_v58 }
  0x69   : > { %2023 = vmatpush3.bf16.msra.mxu1 %v2151_v59  ;;  %2002 = vmatprep.subr.bf16.mxu0 %v2152_v60 }
  0x6a   : > { %2024 = vmatprep.subr.bf16.mxu1 %v2153_v61  ;;  %1583 = vmatprep.mubr.bf16.mxu0 %v1725_v28 }
  0x6b   : > { %1624 = vmatprep.mubr.bf16.mxu1 %v1727_v31 }
  0x6c   : > { %2003 = vmatpush3.bf16.msra.mxu0 %v2154_v62 }
  0x6d   : > { %2025 = vmatpush3.bf16.msra.mxu1 %v2155_v63  ;;  %2004 = vmatprep.subr.bf16.mxu0 %v2156_v0 }
  0x6e   : > { %2026 = vmatprep.subr.bf16.mxu1 %v2157_v1 }
  0x70   : > { %2005 = vmatpush3.bf16.msra.mxu0 %v2158_v2 }
  0x71   : > { %2027 = vmatpush3.bf16.msra.mxu1 %v2159_v3  ;;  %2006 = vmatprep.subr.bf16.mxu0 %v2160_v4 }
  0x72   : > { %2028 = vmatprep.subr.bf16.mxu1 %v2161_v5 }
  0x74   : > { %2007 = vmatpush3.bf16.msra.mxu0 %v2162_v6 }
  0x75   : > { %2029 = vmatpush3.bf16.msra.mxu1 %v2163_v7  ;;  %2008 = vmatprep.subr.bf16.mxu0 %v2164_v8 }
  0x76   : > { %2030 = vmatprep.subr.bf16.mxu1 %v2165_v9 }
  0x78   : > { %2009 = vmatpush3.bf16.msra.mxu0 %v2166_v10 }
  0x79   : > { %2031 = vmatpush3.bf16.msra.mxu1 %v2167_v11  ;;  %2010 = vmatprep.subr.bf16.mxu0 %v2168_v12 }
  0x7a   : > { %2032 = vmatprep.subr.bf16.mxu1 %v2169_v13 }
  0x7c   : > { %2011 = vmatpush3.bf16.msra.mxu0 %v2170_v14 }
  0x7d   : > { %2033 = vmatpush3.bf16.msra.mxu1 %v2171_v15  ;;  %2012 = vmatprep.subr.bf16.mxu0 %v2172_v16 }
  0x7e   : > { %2034 = vmatprep.subr.bf16.mxu1 %v2173_v17 }
  0x80   : > { %2013 = vmatpush3.bf16.msra.mxu0 %v2174_v18 }
  0x81   : > { %2035 = vmatpush3.bf16.msra.mxu1 %v2175_v19  ;;  %2014 = vmatprep.subr.bf16.mxu0 %v2176_v20 }
  0x82   : > { %2036 = vmatprep.subr.bf16.mxu1 %v2177_v21 }
  0x84   : > { %2015 = vmatpush3.bf16.msra.mxu0 %v2178_v22 }
  0x85   : > { %2037 = vmatpush3.bf16.msra.mxu1 %v2179_v23 }
  0x87   : > { %1584 = vmatmul.mubr.bf16.vlgmr.msra.gmra.mrb[12].mxu0 %v1724_v27 }
  0x88   : > { %1625 = vmatmul.mubr.bf16.vlgmr.msra.gmra.mrb[12].mxu1 %v1726_v30 }
  0xfa   : > { %v1884_v32 = vpop.f32.mrb[0].mxu0 }
  0xfb   : > { %v1906_v33 = vpop.f32.mrb[0].mxu1  ;;  %v1885_v35 = vpop.f32.mrb[1].mxu0 }
  0xfc   : > { %v1886_v36 = vadd.f32 %v1885_v35, %v1884_v32  ;;  %v1907_v37 = vpop.f32.mrb[1].mxu1  ;;  %v1887_v38 = vpop.f32.mrb[2].mxu0 }
  0xfd   : > { %v1908_v39 = vadd.f32 %v1907_v37, %v1906_v33  ;;  %v1909_v40 = vpop.f32.mrb[2].mxu1  ;;  %v1888_v41 = vpop.f32.mrb[3].mxu0 }
  0xfe   : > { %v1340_v42 = vadd.f32 %v1886_v36, %v1711_v34  ;;  %v1889_v43 = vadd.f32 %v1888_v41, %v1887_v38  ;;  %v1910_v44 = vpop.f32.mrb[3].mxu1 }
  0xff   : > { %v1911_v45 = vadd.f32 %v1910_v44, %v1909_v40 }
 0x100   : > { %v1381_v46 = vadd.f32 %v1908_v39, %v1340_v42  ;;  %v1343_v47 = vadd.f32 %v1889_v43, %v1711_v34 }
 0x102   : > { %v1384_v48 = vadd.f32 %v1911_v45, %v1343_v47 }
 0x11a   : > { %v1928_v49 = vpop.f32.mrb[4].mxu0 }
 0x11b   : > { %v1950_v50 = vpop.f32.mrb[4].mxu1  ;;  %v1929_v51 = vpop.f32.mrb[5].mxu0 }
 0x11c   : > { %v1930_v52 = vadd.f32 %v1929_v51, %v1928_v49  ;;  %v1951_v53 = vpop.f32.mrb[5].mxu1  ;;  %v1931_v54 = vpop.f32.mrb[6].mxu0 }
 0x11d   : > { %v1952_v55 = vadd.f32 %v1951_v53, %v1950_v50  ;;  %v1953_v56 = vpop.f32.mrb[6].mxu1  ;;  %v1932_v57 = vpop.f32.mrb[7].mxu0 }
 0x11e   : > { %v1422_v58 = vadd.f32 %v1930_v52, %v1381_v46  ;;  %v1933_v59 = vadd.f32 %v1932_v57, %v1931_v54  ;;  %v1954_v60 = vpop.f32.mrb[7].mxu1 }
 0x11f   : > { %v1955_v61 = vadd.f32 %v1954_v60, %v1953_v56 }
 0x120   : > { %v1463_v62 = vadd.f32 %v1952_v55, %v1422_v58  ;;  %v1425_v63 = vadd.f32 %v1933_v59, %v1384_v48 }
 0x122   : > { %v1466_v0 = vadd.f32 %v1955_v61, %v1425_v63 }
 0x13a   : > { %v1972_v1 = vpop.f32.mrb[8].mxu0 }
 0x13b   : > { %v1994_v2 = vpop.f32.mrb[8].mxu1  ;;  %v1973_v3 = vpop.f32.mrb[9].mxu0 }
 0x13c   : > { %v1995_v4 = vpop.f32.mrb[9].mxu1  ;;  %v1974_v5 = vadd.f32 %v1973_v3, %v1972_v1  ;;  %v1975_v7 = vpop.f32.mrb[10].mxu0 }
 0x13d   : > { %v1996_v6 = vadd.f32 %v1995_v4, %v1994_v2  ;;  %v1997_v8 = vpop.f32.mrb[10].mxu1  ;;  %v1976_v9 = vpop.f32.mrb[11].mxu0 }
 0x13e   : > { %v1998_v10 = vpop.f32.mrb[11].mxu1  ;;  %v1504_v11 = vadd.f32 %v1974_v5, %v1463_v62  ;;  %v1977_v12 = vadd.f32 %v1976_v9, %v1975_v7 }
 0x13f   : > { %v1999_v13 = vadd.f32 %v1998_v10, %v1997_v8 }
 0x140   : > { %v1545_v14 = vadd.f32 %v1996_v6, %v1504_v11  ;;  %v1507_v15 = vadd.f32 %v1977_v12, %v1466_v0 }
 0x142   : > { %v1548_v16 = vadd.f32 %v1999_v13, %v1507_v15 }
 0x15a   : > { %v2016_v17 = vpop.f32.mrb[12].mxu0 }
 0x15b   : > { %v2038_v18 = vpop.f32.mrb[12].mxu1  ;;  %v2017_v19 = vpop.f32.mrb[13].mxu0 }
 0x15c   : > { %v2018_v20 = vadd.f32 %v2017_v19, %v2016_v17  ;;  %v2039_v21 = vpop.f32.mrb[13].mxu1  ;;  %v2019_v22 = vpop.f32.mrb[14].mxu0 }
 0x15d   : > { %v2040_v23 = vadd.f32 %v2039_v21, %v2038_v18  ;;  %v2041_v24 = vpop.f32.mrb[14].mxu1  ;;  %v2020_v25 = vpop.f32.mrb[15].mxu0 }
 0x15e   : > { %v1586_v26 = vadd.f32 %v2018_v20, %v1545_v14  ;;  %v2021_v27 = vadd.f32 %v2020_v25, %v2019_v22  ;;  %v2042_v28 = vpop.f32.mrb[15].mxu1 }
 0x15f   : > { %v2043_v29 = vadd.f32 %v2042_v28, %v2041_v24 }
 0x160   : > { %v1627_v30 = vadd.f32 %v2040_v23, %v1586_v26  ;;  %v1589_v31 = vadd.f32 %v2021_v27, %v1548_v16 }
 0x162   : > { %v1630_v32 = vadd.f32 %v2043_v29, %v1589_v31  ;;  %v1633_v33 = vmax.f32 %v1627_v30, 0.0 }
 0x164   : > { %v1634_v34 = vmax.f32 %v1630_v32, 0.0 }
 0x166   : > { %v1866_v35 = vpack.c.bf16 %v1634_v34, %v1633_v33 }
 0x168   : > { %1867 = vst [vmem:[%s175_s9] sm:$0xff] %v1866_v35  }
 0x169 PF: > { %s13_s12 = sadd.s32 1, %s2186_s12  }
 0x16a   : > { %p10_p4 = scmp.ge.s32.totalorder %s13_s12, 4  }
 0x16c   :  { %12 = sbr.rel (!%p10_p4) target bundleno = 1 (0x1), region = 62 }

// kernel: dqn_forward.5
= control target key start
LH: loop header
LB: loop body
LE: loop exit
PB: predicated region body
PF: predicated region fallthrough
CT: control target
= control target key end

     0   :  { %vm2014_vm0 = vmmov 0   ;;  %s2506_s1 = inlined_call_operand.vmem [shape: bf16[1152,128], index: 1, kind: input, shape index: {}]   ;;  %s2507_s0 = inlined_call_operand.vmem [shape: bf16[16,1152], index: 0, kind: input, shape index: {}]   ;;  %s2508_s3 = inlined_call_operand.vmem [shape: bf16[128,512], index: 3, kind: input, shape index: {}]   ;;  %s2509_s5 = inlined_call_operand.vmem [shape: bf16[512,128], index: 5, kind: input, shape index: {}]   ;;  %s2510_s2 = inlined_call_operand.vmem [shape: f32[1,128], index: 2, kind: input, shape index: {}]   ;;  %s2511_s4 = inlined_call_operand.vmem [shape: f32[1,512], index: 4, kind: input, shape index: {}]   ;;  %s2512_s6 = inlined_call_operand.vmem [shape: f32[1,128], index: 6, kind: input, shape index: {}]   ;;  %s2513_s7 = inlined_call_operand.vmem [shape: f32[16,128], index: 7, kind: output, shape index: {}]  }
   0x1   :  { %v1848_v0 = vld [vmem:[%s2506_s1 + $0x40] sm:$0xff]   ;;  %v1852_v4 = vld [vmem:[%s2506_s1 + $0x48] sm:$0xff]   ;;  %v1856_v8 = vld [vmem:[%s2506_s1 + $0x50] sm:$0xff]  }
   0x2   :  { %v1849_v1 = vld [vmem:[%s2506_s1] sm:$0xff]   ;;  %1684 = vmatprep.subr.bf16.mxu0 %v1848_v0  ;;  %v1853_v5 = vld [vmem:[%s2506_s1 + $0x8] sm:$0xff]   ;;  %v1857_v9 = vld [vmem:[%s2506_s1 + $0x10] sm:$0xff]  }
   0x3   :  { %v1850_v2 = vld [vmem:[%s2506_s1 + $0xc0] sm:$0xff]   ;;  %1685 = vmatpush3.bf16.msra.mxu0 %v1849_v1  ;;  %v1854_v6 = vld [vmem:[%s2506_s1 + $0xc8] sm:$0xff]   ;;  %v1858_v10 = vld [vmem:[%s2506_s1 + $0xd0] sm:$0xff]  }
   0x4   :  { %v1851_v3 = vld [vmem:[%s2506_s1 + $0x80] sm:$0xff]   ;;  %1706 = vmatprep.subr.bf16.mxu1 %v1850_v2  ;;  %1686 = vmatprep.subr.bf16.mxu0 %v1852_v4  ;;  %v1855_v7 = vld [vmem:[%s2506_s1 + $0x88] sm:$0xff]   ;;  %v1859_v11 = vld [vmem:[%s2506_s1 + $0x90] sm:$0xff]  }
   0x5   :  { %1707 = vmatpush3.bf16.msra.mxu1 %v1851_v3  ;;  %v1860_v12 = vld [vmem:[%s2506_s1 + $0x58] sm:$0xff]   ;;  %v1864_v16 = vld [vmem:[%s2506_s1 + $0x60] sm:$0xff]   ;;  %v1868_v20 = vld [vmem:[%s2506_s1 + $0x68] sm:$0xff]  }
   0x6   :  { %1708 = vmatprep.subr.bf16.mxu1 %v1854_v6  ;;  %v1861_v13 = vld [vmem:[%s2506_s1 + $0x18] sm:$0xff]   ;;  %v1865_v17 = vld [vmem:[%s2506_s1 + $0x20] sm:$0xff]   ;;  %v1869_v21 = vld [vmem:[%s2506_s1 + $0x28] sm:$0xff]   ;;  %v2013_v6 = vmov 0.0  }
   0x7   :  { %1687 = vmatpush3.bf16.msra.mxu0 %v1853_v5  ;;  %v1862_v14 = vld [vmem:[%s2506_s1 + $0xd8] sm:$0xff]   ;;  %v1866_v18 = vld [vmem:[%s2506_s1 + $0xe0] sm:$0xff]   ;;  %v1870_v22 = vld [vmem:[%s2506_s1 + $0xe8] sm:$0xff]  }
   0x8   :  { %1688 = vmatprep.subr.bf16.mxu0 %v1856_v8  ;;  %v1863_v15 = vld [vmem:[%s2506_s1 + $0x98] sm:$0xff]   ;;  %v1867_v19 = vld [vmem:[%s2506_s1 + $0xa0] sm:$0xff]   ;;  %v1871_v23 = vld [vmem:[%s2506_s1 + $0xa8] sm:$0xff]  }
   0x9   :  { %1709 = vmatpush3.bf16.msra.mxu1 %v1855_v7  ;;  %v1872_v24 = vld [vmem:[%s2506_s1 + $0x70] sm:$0xff]   ;;  %v1876_v28 = vld [vmem:[%s2506_s1 + $0x78] sm:$0xff]   ;;  %v1879_v31 = vld [vmem:[%s2507_s0] ss:$36 sps:$4 sm:$0xff]  }
   0xa   :  { %1710 = vmatprep.subr.bf16.mxu1 %v1858_v10  ;;  %v1873_v25 = vld [vmem:[%s2506_s1 + $0x30] sm:$0xff]   ;;  %v1877_v29 = vld [vmem:[%s2506_s1 + $0x38] sm:$0xff]   ;;  %v1881_v32 = vld [vmem:[%s2507_s0 + $0x4] ss:$36 sps:$4 sm:$0xff]  }
   0xb   :  { %1689 = vmatpush3.bf16.msra.mxu0 %v1857_v9  ;;  %v1874_v26 = vld [vmem:[%s2506_s1 + $0xf0] sm:$0xff]   ;;  %v1878_v30 = vld [vmem:[%s2506_s1 + $0xf8] sm:$0xff]   ;;  %698 = vmatprep.mubr.bf16.mxu0 %v1881_v32  ;;  %v1883_v34 = vld [vmem:[%s2506_s1 + $0x140] sm:$0xff]  }
   0xc   :  { %1690 = vmatprep.subr.bf16.mxu0 %v1860_v12  ;;  %v1875_v27 = vld [vmem:[%s2506_s1 + $0xb0] sm:$0xff]   ;;  %v1882_v33 = vld [vmem:[%s2506_s1 + $0xb8] sm:$0xff]   ;;  %v1884_v35 = vld [vmem:[%s2507_s0 + $0x8] ss:$36 sps:$4 sm:$0xff]  }
   0xd   :  { %1711 = vmatpush3.bf16.msra.mxu1 %v1859_v11  ;;  %v1886_v36 = vld [vmem:[%s2507_s0 + $0xc] ss:$36 sps:$4 sm:$0xff]   ;;  %v1887_v37 = vld [vmem:[%s2506_s1 + $0x100] sm:$0xff]   ;;  %v1898_v48 = vld [vmem:[%s2506_s1 + $0x158] sm:$0xff]  }
   0xe   :  { %1712 = vmatprep.subr.bf16.mxu1 %v1862_v14  ;;  %739 = vmatprep.mubr.bf16.mxu1 %v1886_v36  ;;  %v1888_v38 = vld [vmem:[%s2506_s1 + $0x1c0] sm:$0xff]   ;;  %v1890_v40 = vld [vmem:[%s2506_s1 + $0x148] sm:$0xff]   ;;  %v1894_v44 = vld [vmem:[%s2506_s1 + $0x150] sm:$0xff]  }
   0xf   :  { %1691 = vmatpush3.bf16.msra.mxu0 %v1861_v13  ;;  %v1889_v39 = vld [vmem:[%s2506_s1 + $0x180] sm:$0xff]   ;;  %v1891_v41 = vld [vmem:[%s2506_s1 + $0x108] sm:$0xff]   ;;  %v1895_v45 = vld [vmem:[%s2506_s1 + $0x110] sm:$0xff]  }
  0x10   :  { %1692 = vmatprep.subr.bf16.mxu0 %v1864_v16  ;;  %v1892_v42 = vld [vmem:[%s2506_s1 + $0x1c8] sm:$0xff]   ;;  %v1896_v46 = vld [vmem:[%s2506_s1 + $0x1d0] sm:$0xff]   ;;  %v1899_v49 = vld [vmem:[%s2506_s1 + $0x118] sm:$0xff]  }
  0x11   :  { %1713 = vmatpush3.bf16.msra.mxu1 %v1863_v15  ;;  %v1893_v43 = vld [vmem:[%s2506_s1 + $0x188] sm:$0xff]   ;;  %v1897_v47 = vld [vmem:[%s2506_s1 + $0x190] sm:$0xff]   ;;  %v1900_v50 = vld [vmem:[%s2506_s1 + $0x1d8] sm:$0xff]  }
  0x12   :  { %1714 = vmatprep.subr.bf16.mxu1 %v1866_v18  ;;  %v1901_v51 = vld [vmem:[%s2506_s1 + $0x198] sm:$0xff]   ;;  %v1902_v52 = vld [vmem:[%s2506_s1 + $0x160] sm:$0xff]   ;;  %v1906_v56 = vld [vmem:[%s2506_s1 + $0x168] sm:$0xff]  }
  0x13   :  { %1693 = vmatpush3.bf16.msra.mxu0 %v1865_v17  ;;  %v1903_v53 = vld [vmem:[%s2506_s1 + $0x120] sm:$0xff]   ;;  %v1907_v57 = vld [vmem:[%s2506_s1 + $0x128] sm:$0xff]   ;;  %v1910_v60 = vld [vmem:[%s2506_s1 + $0x170] sm:$0xff]  }
  0x14   :  { %1694 = vmatprep.subr.bf16.mxu0 %v1868_v20  ;;  %v1904_v54 = vld [vmem:[%s2506_s1 + $0x1e0] sm:$0xff]   ;;  %v1908_v58 = vld [vmem:[%s2506_s1 + $0x1e8] sm:$0xff]   ;;  %v1911_v61 = vld [vmem:[%s2506_s1 + $0x130] sm:$0xff]  }
  0x15   :  { %1715 = vmatpush3.bf16.msra.mxu1 %v1867_v19  ;;  %v1905_v55 = vld [vmem:[%s2506_s1 + $0x1a0] sm:$0xff]   ;;  %v1909_v59 = vld [vmem:[%s2506_s1 + $0x1a8] sm:$0xff]   ;;  %v1912_v62 = vld [vmem:[%s2506_s1 + $0x1f0] sm:$0xff]  }
  0x16   :  { %1716 = vmatprep.subr.bf16.mxu1 %v1870_v22  ;;  %v1913_v63 = vld [vmem:[%s2506_s1 + $0x1b0] sm:$0xff]   ;;  %v1914_v0 = vld [vmem:[%s2506_s1 + $0x178] sm:$0xff]   ;;  %v1924_v9 = vld [vmem:[%s2506_s1 + $0x200] sm:$0xff]  }
  0x17   :  { %1695 = vmatpush3.bf16.msra.mxu0 %v1869_v21  ;;  %v1915_v1 = vld [vmem:[%s2506_s1 + $0x138] sm:$0xff]   ;;  %v1917_v3 = vld [vmem:[%s2507_s0 + $0x10] ss:$36 sps:$4 sm:$0xff]   ;;  %v1925_v10 = vld [vmem:[%s2506_s1 + $0x208] sm:$0xff]  }
  0x18   :  { %1696 = vmatprep.subr.bf16.mxu0 %v1872_v24  ;;  %v1916_v2 = vld [vmem:[%s2506_s1 + $0x1f8] sm:$0xff]   ;;  %v1926_v11 = vld [vmem:[%s2506_s1 + $0x210] sm:$0xff]   ;;  %v1928_v13 = vld [vmem:[%s2506_s1 + $0x220] sm:$0xff]  }
  0x19   :  { %1717 = vmatpush3.bf16.msra.mxu1 %v1871_v23  ;;  %v1919_v4 = vld [vmem:[%s2507_s0 + $0x14] ss:$36 sps:$4 sm:$0xff]   ;;  %v1923_v8 = vld [vmem:[%s2507_s0 + $0x1c] ss:$36 sps:$4 sm:$0xff]   ;;  %v1929_v14 = vld [vmem:[%s2506_s1 + $0x228] sm:$0xff]  }
  0x1a   :  { %1718 = vmatprep.subr.bf16.mxu1 %v1874_v26  ;;  %v1920_v5 = vld [vmem:[%s2506_s1 + $0x1b8] sm:$0xff]   ;;  %v1930_v15 = vld [vmem:[%s2506_s1 + $0x230] sm:$0xff]   ;;  %v1932_v17 = vld [vmem:[%s2507_s0 + $0x20] ss:$36 sps:$4 sm:$0xff]  }
  0x1b   :  { %1697 = vmatpush3.bf16.msra.mxu0 %v1873_v25  ;;  %v1921_v7 = vld [vmem:[%s2507_s0 + $0x18] ss:$36 sps:$4 sm:$0xff]   ;;  %v1933_v18 = vld [vmem:[%s2508_s3] ss:$16 sps:$4 sm:$0xff]   ;;  %v1935_v19 = vld [vmem:[%s2508_s3 + $0x4] ss:$16 sps:$4 sm:$0xff]  }
  0x1c   :  { %1698 = vmatprep.subr.bf16.mxu0 %v1876_v28  ;;  %v1927_v12 = vld [vmem:[%s2506_s1 + $0x218] sm:$0xff]   ;;  %v1939_v22 = vld [vmem:[%s2508_s3 + $0x20] ss:$16 sps:$4 sm:$0xff]   ;;  %v1941_v23 = vld [vmem:[%s2508_s3 + $0x24] ss:$16 sps:$4 sm:$0xff]  }
  0x1d   :  { %1719 = vmatpush3.bf16.msra.mxu1 %v1875_v27  ;;  %v1931_v16 = vld [vmem:[%s2506_s1 + $0x238] sm:$0xff]   ;;  %v1947_v26 = vld [vmem:[%s2508_s3 + $0x44] ss:$16 sps:$4 sm:$0xff]   ;;  %v1945_v27 = vld [vmem:[%s2508_s3 + $0x40] ss:$16 sps:$4 sm:$0xff]  }
  0x1e   :  { %1720 = vmatprep.subr.bf16.mxu1 %v1878_v30  ;;  %v1936_v20 = vld [vmem:[%s2508_s3 + $0x8] ss:$16 sps:$4 sm:$0xff]   ;;  %v1938_v21 = vld [vmem:[%s2508_s3 + $0xc] ss:$16 sps:$4 sm:$0xff]   ;;  %v1953_v30 = vld [vmem:[%s2508_s3 + $0x64] ss:$16 sps:$4 sm:$0xff]  }
  0x1f   :  { %1699 = vmatpush3.bf16.msra.mxu0 %v1877_v29  ;;  %v1942_v24 = vld [vmem:[%s2508_s3 + $0x28] ss:$16 sps:$4 sm:$0xff]   ;;  %v1944_v25 = vld [vmem:[%s2508_s3 + $0x2c] ss:$16 sps:$4 sm:$0xff]   ;;  %v1951_v32 = vld [vmem:[%s2508_s3 + $0x60] ss:$16 sps:$4 sm:$0xff]  }
  0x20   :  { %1728 = vmatprep.subr.bf16.mxu0 %v1883_v34  ;;  %v1950_v28 = vld [vmem:[%s2508_s3 + $0x4c] ss:$16 sps:$4 sm:$0xff]   ;;  %v1948_v29 = vld [vmem:[%s2508_s3 + $0x48] ss:$16 sps:$4 sm:$0xff]   ;;  %v1959_v34 = vld [vmem:[%s2508_s3 + $0x84] ss:$16 sps:$4 sm:$0xff]  }
  0x21   :  { %1721 = vmatpush3.bf16.msra.mxu1 %v1882_v33  ;;  %v1954_v33 = vld [vmem:[%s2508_s3 + $0x68] ss:$16 sps:$4 sm:$0xff]   ;;  %v1962_v36 = vld [vmem:[%s2508_s3 + $0x8c] ss:$16 sps:$4 sm:$0xff]  }
  0x22   :  { %699 = vmatmul.mubr.bf16.vlgmr.msra.gmra.mrb[0].mxu0 %v1879_v31  ;;  %1750 = vmatprep.subr.bf16.mxu1 %v1888_v38  ;;  %v1956_v31 = vld [vmem:[%s2508_s3 + $0x6c] ss:$16 sps:$4 sm:$0xff]   ;;  %v1965_v38 = vld [vmem:[%s2508_s3 + $0xa4] ss:$16 sps:$4 sm:$0xff]  }
  0x23   :  { %1729 = vmatpush3.bf16.msra.mxu0 %v1887_v37  ;;  %780 = vmatprep.mubr.bf16.mxu0 %v1919_v4  ;;  %v1960_v37 = vld [vmem:[%s2508_s3 + $0x88] ss:$16 sps:$4 sm:$0xff]  }
  0x24   :  { %740 = vmatmul.mubr.bf16.vlgmr.msra.gmra.mrb[0].mxu1 %v1884_v35  ;;  %1730 = vmatprep.subr.bf16.mxu0 %v1890_v40  ;;  %v1957_v35 = vld [vmem:[%s2508_s3 + $0x80] ss:$16 sps:$4 sm:$0xff]  }
  0x25   :  { %1751 = vmatpush3.bf16.msra.mxu1 %v1889_v39  ;;  %821 = vmatprep.mubr.bf16.mxu1 %v1923_v8  ;;  %v1968_v39 = vld [vmem:[%s2508_s3 + $0xac] ss:$16 sps:$4 sm:$0xff]   ;;  %v1963_v40 = vld [vmem:[%s2508_s3 + $0xa0] ss:$16 sps:$4 sm:$0xff]  }
  0x26   :  { %1752 = vmatprep.subr.bf16.mxu1 %v1892_v42  ;;  %v1971_v42 = vld [vmem:[%s2508_s3 + $0xc4] ss:$16 sps:$4 sm:$0xff]  }
  0x27   :  { %1731 = vmatpush3.bf16.msra.mxu0 %v1891_v41  ;;  %v1966_v41 = vld [vmem:[%s2508_s3 + $0xa8] ss:$16 sps:$4 sm:$0xff]  }
  0x28   :  { %1732 = vmatprep.subr.bf16.mxu0 %v1894_v44  ;;  %v1969_v44 = vld [vmem:[%s2508_s3 + $0xc0] ss:$16 sps:$4 sm:$0xff]  }
  0x29   :  { %1753 = vmatpush3.bf16.msra.mxu1 %v1893_v43  ;;  %v1974_v43 = vld [vmem:[%s2508_s3 + $0xcc] ss:$16 sps:$4 sm:$0xff]  }
  0x2a   :  { %1754 = vmatprep.subr.bf16.mxu1 %v1896_v46  ;;  %v1977_v46 = vld [vmem:[%s2508_s3 + $0xe4] ss:$16 sps:$4 sm:$0xff]  }
  0x2b   :  { %1733 = vmatpush3.bf16.msra.mxu0 %v1895_v45  ;;  %v1972_v45 = vld [vmem:[%s2508_s3 + $0xc8] ss:$16 sps:$4 sm:$0xff]  }
  0x2c   :  { %1734 = vmatprep.subr.bf16.mxu0 %v1898_v48  ;;  %v1975_v48 = vld [vmem:[%s2508_s3 + $0xe0] ss:$16 sps:$4 sm:$0xff]  }
  0x2d   :  { %1755 = vmatpush3.bf16.msra.mxu1 %v1897_v47  ;;  %v1980_v47 = vld [vmem:[%s2508_s3 + $0xec] ss:$16 sps:$4 sm:$0xff]  }
  0x2e   :  { %1756 = vmatprep.subr.bf16.mxu1 %v1900_v50  ;;  %v2015_v50 = vmov 0  }
  0x2f   :  { %1735 = vmatpush3.bf16.msra.mxu0 %v1899_v49  ;;  %v1978_v49 = vld [vmem:[%s2508_s3 + $0xe8] ss:$16 sps:$4 sm:$0xff]  }
  0x30   :  { %1736 = vmatprep.subr.bf16.mxu0 %v1902_v52  ;;  %v1982_v52 = vld [vmem:[%s2509_s5 + $0xc0] sm:$0xff]  }
  0x31   :  { %1757 = vmatpush3.bf16.msra.mxu1 %v1901_v51  ;;  %v1981_v51 = vld [vmem:[%s2509_s5 + $0x40] sm:$0xff]  }
  0x32   :  { %1758 = vmatprep.subr.bf16.mxu1 %v1904_v54  ;;  %v1537_v54 = vld [vmem:[%s2510_s2] ss:$0 sm:$0xff] }
  0x33   :  { %1737 = vmatpush3.bf16.msra.mxu0 %v1903_v53 }
  0x34   :  { %1738 = vmatprep.subr.bf16.mxu0 %v1906_v56 }
  0x35   :  { %1759 = vmatpush3.bf16.msra.mxu1 %v1905_v55 }
  0x36   :  { %1760 = vmatprep.subr.bf16.mxu1 %v1908_v58 }
  0x37   :  { %1739 = vmatpush3.bf16.msra.mxu0 %v1907_v57 }
  0x38   :  { %1740 = vmatprep.subr.bf16.mxu0 %v1910_v60 }
  0x39   :  { %1761 = vmatpush3.bf16.msra.mxu1 %v1909_v59 }
  0x3a   :  { %1762 = vmatprep.subr.bf16.mxu1 %v1912_v62 }
  0x3b   :  { %1741 = vmatpush3.bf16.msra.mxu0 %v1911_v61 }
  0x3c   :  { %1742 = vmatprep.subr.bf16.mxu0 %v1914_v0 }
  0x3d   :  { %1763 = vmatpush3.bf16.msra.mxu1 %v1913_v63 }
  0x3e   :  { %1764 = vmatprep.subr.bf16.mxu1 %v1916_v2 }
  0x3f   :  { %1743 = vmatpush3.bf16.msra.mxu0 %v1915_v1 }
  0x40   :  { %1825 = vmatprep.subr.bf16.mxu0 %v2013_v6 }
  0x41   :  { %1765 = vmatpush3.bf16.msra.mxu1 %v1920_v5 }
  0x42   :  { %781 = vmatmul.mubr.bf16.vlgmr.msra.gmra.mrb[4].mxu0 %v1917_v3  ;;  %1088 = vmatprep.subr.bf16.mxu1 %v1935_v19 }
  0x43   :  { %1841 = vmatprep.mubr.msk.bf16.mxu0 %vm2014_vm0, %v2013_v6  ;;  %1826 = vmatpush3.bf16.msra.mxu0 %v1924_v9 }
  0x44   :  { %822 = vmatmul.mubr.bf16.vlgmr.msra.gmra.mrb[4].mxu1 %v1921_v7  ;;  %1827 = vmatprep.subr.bf16.mxu0 %v2013_v6 }
  0x45   :  { %1089 = vmatpush1.bf16.msra.mxu1 %v1933_v18  ;;  %1120 = vmatprep.mubr.bf16.mxu1 %v2015_v50 }
  0x46   :  { %1090 = vmatprep.subr.bf16.mxu1 %v1941_v23 }
  0x47   :  { %1828 = vmatpush3.bf16.msra.mxu0 %v1925_v10 }
  0x48   :  { %1829 = vmatprep.subr.bf16.mxu0 %v2013_v6 }
  0x49   :  { %1091 = vmatpush1.bf16.msra.mxu1 %v1939_v22 }
  0x4a   :  { %1092 = vmatprep.subr.bf16.mxu1 %v1947_v26 }
  0x4b   :  { %1830 = vmatpush3.bf16.msra.mxu0 %v1926_v11 }
  0x4c   :  { %1831 = vmatprep.subr.bf16.mxu0 %v2013_v6 }
  0x4d   :  { %1093 = vmatpush1.bf16.msra.mxu1 %v1945_v27 }
  0x4e   :  { %1094 = vmatprep.subr.bf16.mxu1 %v1953_v30  ;;  %v1983_v30 = vld [vmem:[%s2509_s5] sm:$0xff]  }
  0x4f   :  { %1832 = vmatpush3.bf16.msra.mxu0 %v1927_v12 }
  0x50   :  { %1833 = vmatprep.subr.bf16.mxu0 %v2013_v6 }
  0x51   :  { %1095 = vmatpush1.bf16.msra.mxu1 %v1951_v32 }
  0x52   :  { %1096 = vmatprep.subr.bf16.mxu1 %v1959_v34  ;;  %v1986_v34 = vld [vmem:[%s2509_s5 + $0xc8] sm:$0xff]  }
  0x53   :  { %1834 = vmatpush3.bf16.msra.mxu0 %v1928_v13 }
  0x54   :  { %1835 = vmatprep.subr.bf16.mxu0 %v2013_v6 }
  0x55   :  { %1097 = vmatpush1.bf16.msra.mxu1 %v1957_v35  ;;  %v1987_v35 = vld [vmem:[%s2509_s5 + $0x8] sm:$0xff]  }
  0x56   :  { %1098 = vmatprep.subr.bf16.mxu1 %v1965_v38  ;;  %v1990_v38 = vld [vmem:[%s2509_s5 + $0xd0] sm:$0xff]  }
  0x57   :  { %1836 = vmatpush3.bf16.msra.mxu0 %v1929_v14 }
  0x58   :  { %1837 = vmatprep.subr.bf16.mxu0 %v2013_v6 }
  0x59   :  { %1099 = vmatpush1.bf16.msra.mxu1 %v1963_v40  ;;  %v1992_v40 = vld [vmem:[%s2509_s5 + $0x90] sm:$0xff]  }
  0x5a   :  { %1100 = vmatprep.subr.bf16.mxu1 %v1971_v42  ;;  %v1994_v42 = vld [vmem:[%s2509_s5 + $0xd8] sm:$0xff]  }
  0x5b   :  { %1838 = vmatpush3.bf16.msra.mxu0 %v1930_v15 }
  0x5c   :  { %1839 = vmatprep.subr.bf16.mxu0 %v2013_v6 }
  0x5d   :  { %1101 = vmatpush1.bf16.msra.mxu1 %v1969_v44  ;;  %v1996_v44 = vld [vmem:[%s2509_s5 + $0x98] sm:$0xff]  }
  0x5e   :  { %1102 = vmatprep.subr.bf16.mxu1 %v1977_v46  ;;  %v1998_v46 = vld [vmem:[%s2509_s5 + $0xe0] sm:$0xff]  }
  0x5f   :  { %1840 = vmatpush3.bf16.msra.mxu0 %v1931_v16 }
  0x60   :  { %1131 = vmatprep.subr.bf16.mxu0 %v1938_v21 }
  0x61   :  { %1103 = vmatpush1.bf16.msra.mxu1 %v1975_v48  ;;  %v2000_v48 = vld [vmem:[%s2509_s5 + $0xa0] sm:$0xff]  }
  0x62   :  { %1842 = vmatmul.mubr.bf16.vlgmr.msra.gmra.mrb[8].mxu0 %v1932_v17  ;;  %1781 = vmatprep.subr.bf16.mxu1 %v1981_v51  ;;  %v2003_v51 = vld [vmem:[%s2509_s5 + $0x28] sm:$0xff]  }
  0x63   :  { %1132 = vmatpush1.bf16.msra.mxu0 %v1936_v20  ;;  %1163 = vmatprep.mubr.bf16.mxu0 %v2015_v50  ;;  %v2002_v50 = vld [vmem:[%s2509_s5 + $0xe8] sm:$0xff]  }
  0x64   :  { %1133 = vmatprep.subr.bf16.mxu0 %v1944_v25 }
  0x67   :  { %1134 = vmatpush1.bf16.msra.mxu0 %v1942_v24 }
  0x68   :  { %1135 = vmatprep.subr.bf16.mxu0 %v1950_v28 }
  0x6b   :  { %1136 = vmatpush1.bf16.msra.mxu0 %v1948_v29 }
  0x6c   :  { %1137 = vmatprep.subr.bf16.mxu0 %v1956_v31  ;;  %v1984_v31 = vld [vmem:[%s2509_s5 + $0x80] sm:$0xff]  }
  0x6f   :  { %1138 = vmatpush1.bf16.msra.mxu0 %v1954_v33  ;;  %v1985_v33 = vld [vmem:[%s2509_s5 + $0x48] sm:$0xff]  }
  0x70   :  { %1139 = vmatprep.subr.bf16.mxu0 %v1962_v36  ;;  %v1988_v36 = vld [vmem:[%s2509_s5 + $0x88] sm:$0xff]  }
  0x73   :  { %1140 = vmatpush1.bf16.msra.mxu0 %v1960_v37  ;;  %v1989_v37 = vld [vmem:[%s2509_s5 + $0x50] sm:$0xff]  }
  0x74   :  { %1141 = vmatprep.subr.bf16.mxu0 %v1968_v39  ;;  %v1991_v39 = vld [vmem:[%s2509_s5 + $0x10] sm:$0xff]  }
  0x77   :  { %1142 = vmatpush1.bf16.msra.mxu0 %v1966_v41  ;;  %v1993_v41 = vld [vmem:[%s2509_s5 + $0x58] sm:$0xff]  }
  0x78   :  { %1143 = vmatprep.subr.bf16.mxu0 %v1974_v43  ;;  %v1995_v43 = vld [vmem:[%s2509_s5 + $0x18] sm:$0xff]  }
  0x7b   :  { %1144 = vmatpush1.bf16.msra.mxu0 %v1972_v45  ;;  %v1997_v45 = vld [vmem:[%s2509_s5 + $0x60] sm:$0xff]  }
  0x7c   :  { %1145 = vmatprep.subr.bf16.mxu0 %v1980_v47  ;;  %v1999_v47 = vld [vmem:[%s2509_s5 + $0x20] sm:$0xff]  }
  0x7f   :  { %1146 = vmatpush1.bf16.msra.mxu0 %v1978_v49  ;;  %v2001_v49 = vld [vmem:[%s2509_s5 + $0x68] sm:$0xff]  }
  0x80   :  { %1803 = vmatprep.subr.bf16.mxu0 %v1982_v52  ;;  %v2004_v52 = vld [vmem:[%s2509_s5 + $0xa8] sm:$0xff]  }
  0xf5   :  { %v1700_v53 = vpop.f32.mrb[0].mxu0 }
  0xf6   :  { %v1701_v55 = vpop.f32.mrb[1].mxu0 }
  0xf7   :  { %v1702_v56 = vadd.f32 %v1701_v55, %v1700_v53  ;;  %v1703_v57 = vpop.f32.mrb[2].mxu0  ;;  %v1722_v58 = vpop.f32.mrb[0].mxu1  ;;  %v2005_v53 = vld [vmem:[%s2509_s5 + $0x70] sm:$0xff]  }
  0xf8   :  { %v1704_v59 = vpop.f32.mrb[3].mxu0  ;;  %v1723_v62 = vpop.f32.mrb[1].mxu1  ;;  %v2007_v55 = vld [vmem:[%s2509_s5 + $0x30] sm:$0xff]  }
  0xf9   :  { %v701_v60 = vadd.f32 %v1702_v56, %v1537_v54  ;;  %v1705_v61 = vadd.f32 %v1704_v59, %v1703_v57  ;;  %v1724_v63 = vadd.f32 %v1723_v62, %v1722_v58  ;;  %v1725_v0 = vpop.f32.mrb[2].mxu1  ;;  %v2008_v56 = vld [vmem:[%s2509_s5 + $0xb0] sm:$0xff]   ;;  %v2009_v57 = vld [vmem:[%s2509_s5 + $0x78] sm:$0xff]  }
  0xfa   :  { %v1726_v2 = vpop.f32.mrb[3].mxu1  ;;  %v2010_v58 = vld [vmem:[%s2509_s5 + $0xf8] sm:$0xff]  }
  0xfb   :  { %v704_v1 = vadd.f32 %v1705_v61, %v1537_v54  ;;  %v742_v3 = vadd.f32 %v1724_v63, %v701_v60  ;;  %v1727_v4 = vadd.f32 %v1726_v2, %v1725_v0  ;;  %v2006_v54 = vld [vmem:[%s2509_s5 + $0xf0] sm:$0xff]   ;;  %v2011_v59 = vld [vmem:[%s2509_s5 + $0x38] sm:$0xff]   ;;  %v908_v61 = vlaneseq }
  0xfc   :  { %v2012_v60 = vld [vmem:[%s2509_s5 + $0xb8] sm:$0xff]  }
  0xfd   :  { %v745_v5 = vadd.f32 %v1727_v4, %v704_v1  ;;  %v909_v62 = vshrl.u32 %v908_v61, 7  ;;  %v906_v1 = vld [vmem:[%s2511_s4] sm:$0xf] }
  0xff   :  { %v910_v63 = vsub.s32 0, %v909_v62  ;;  %v918_v0 = vsub.s32 2, %v909_v62  ;;  %v914_v2 = vsub.s32 1, %v909_v62 }
 0x101   :  { %v911_v4 = vrot.slane %v906_v1, %v910_v63 }
 0x115   :  { %v1744_v6 = vpop.f32.mrb[4].mxu0 }
 0x116   :  { %v1745_v7 = vpop.f32.mrb[5].mxu0 }
 0x117   :  { %v1746_v8 = vadd.f32 %v1745_v7, %v1744_v6  ;;  %v1747_v9 = vpop.f32.mrb[6].mxu0  ;;  %v1766_v10 = vpop.f32.mrb[4].mxu1  ;;  %v915_v6 = vrot.slane %v906_v1, %v914_v2 }
 0x118   :  { %v1748_v11 = vpop.f32.mrb[7].mxu0  ;;  %v1767_v14 = vpop.f32.mrb[5].mxu1 }
 0x119   :  { %v783_v12 = vadd.f32 %v1746_v8, %v742_v3  ;;  %v1749_v13 = vadd.f32 %v1748_v11, %v1747_v9  ;;  %v1768_v15 = vadd.f32 %v1767_v14, %v1766_v10  ;;  %v1769_v16 = vpop.f32.mrb[6].mxu1  ;;  %v922_v3 = vsub.s32 3, %v909_v62 }
 0x11a   :  { %v1770_v18 = vpop.f32.mrb[7].mxu1 }
 0x11b   :  { %v786_v17 = vadd.f32 %v1749_v13, %v745_v5  ;;  %v1771_v19 = vadd.f32 %v1770_v18, %v1769_v16  ;;  %v824_v20 = vadd.f32 %v1768_v15, %v783_v12  ;;  %v919_v5 = vrot.slane %v906_v1, %v918_v0 }
 0x11c   :  { %v923_v7 = vrot.slane %v906_v1, %v922_v3 }
 0x11d   :  { %v827_v21 = vadd.f32 %v1771_v19, %v786_v17 }
 0x135   :  { %v864_v22 = vpop.f32.mrb[8].mxu0 }
 0x136   :  { %v865_v23 = vadd.f32 %v864_v22, %v824_v20  ;;  %v1843_v24 = vpop.f32.mrb[9].mxu0 }
 0x137   :  { %v867_v25 = vpop.f32.mrb[10].mxu0 }
 0x138   :  { %v868_v26 = vadd.f32 %v867_v25, %v827_v21  ;;  %v1844_v27 = vpop.f32.mrb[11].mxu0  ;;  %v871_v28 = vmax.f32 %v865_v23, 0.0 }
 0x13a   :  { %v872_v29 = vmax.f32 %v868_v26, 0.0 }
 0x13c   :  { %v873_v32 = vpack.c.bf16 %v872_v29, %v871_v28 }
 0x13e   :  { %1121 = vmatmul.mubr.bf16.vlgmr.msra.gmra.mrb[8].mxu1 %v873_v32  ;;  %1164 = vmatmul.mubr.bf16.vlgmr.msra.gmra.mrb[12].mxu0 %v873_v32 }
 0x13f   :  { %1782 = vmatpush3.bf16.msra.mxu1 %v1983_v30  ;;  %1804 = vmatpush3.bf16.msra.mxu0 %v1984_v31 }
 0x140   :  { %1783 = vmatprep.subr.bf16.mxu1 %v1985_v33  ;;  %1805 = vmatprep.subr.bf16.mxu0 %v1986_v34 }
 0x143   :  { %1784 = vmatpush3.bf16.msra.mxu1 %v1987_v35  ;;  %1806 = vmatpush3.bf16.msra.mxu0 %v1988_v36 }
 0x144   :  { %1785 = vmatprep.subr.bf16.mxu1 %v1989_v37  ;;  %1807 = vmatprep.subr.bf16.mxu0 %v1990_v38  ;;  %v1651_v38 = vld [vmem:[%s2512_s6] ss:$0 sm:$0xff] }
 0x147   :  { %1786 = vmatpush3.bf16.msra.mxu1 %v1991_v39  ;;  %1808 = vmatpush3.bf16.msra.mxu0 %v1992_v40 }
 0x148   :  { %1787 = vmatprep.subr.bf16.mxu1 %v1993_v41  ;;  %1809 = vmatprep.subr.bf16.mxu0 %v1994_v42 }
 0x14b   :  { %1788 = vmatpush3.bf16.msra.mxu1 %v1995_v43  ;;  %1810 = vmatpush3.bf16.msra.mxu0 %v1996_v44 }
 0x14c   :  { %1789 = vmatprep.subr.bf16.mxu1 %v1997_v45  ;;  %1811 = vmatprep.subr.bf16.mxu0 %v1998_v46 }
 0x14f   :  { %1790 = vmatpush3.bf16.msra.mxu1 %v1999_v47  ;;  %1812 = vmatpush3.bf16.msra.mxu0 %v2000_v48 }
 0x150   :  { %1791 = vmatprep.subr.bf16.mxu1 %v2001_v49  ;;  %1813 = vmatprep.subr.bf16.mxu0 %v2002_v50 }
 0x153   :  { %1792 = vmatpush3.bf16.msra.mxu1 %v2003_v51  ;;  %1814 = vmatpush3.bf16.msra.mxu0 %v2004_v52 }
 0x154   :  { %1793 = vmatprep.subr.bf16.mxu1 %v2005_v53  ;;  %1815 = vmatprep.subr.bf16.mxu0 %v2006_v54 }
 0x157   :  { %1794 = vmatpush3.bf16.msra.mxu1 %v2007_v55  ;;  %1816 = vmatpush3.bf16.msra.mxu0 %v2008_v56 }
 0x158   :  { %1795 = vmatprep.subr.bf16.mxu1 %v2009_v57  ;;  %1817 = vmatprep.subr.bf16.mxu0 %v2010_v58 }
 0x15b   :  { %1796 = vmatpush3.bf16.msra.mxu1 %v2011_v59  ;;  %1818 = vmatpush3.bf16.msra.mxu0 %v2012_v60 }
 0x211   :  { %v1122_v8 = vpop.f32.mrb[8].mxu1  ;;  %v1165_v9 = vpop.f32.mrb[12].mxu0 }
 0x212   :  { %v1123_v10 = vadd.f32 %v1122_v8, %v911_v4  ;;  %v1166_v11 = vadd.f32 %v1165_v9, %v919_v5  ;;  %v1124_v12 = vpop.f32.mrb[9].mxu1  ;;  %v1167_v13 = vpop.f32.mrb[13].mxu0 }
 0x213   :  { %v1125_v14 = vadd.f32 %v1124_v12, %v915_v6  ;;  %v1168_v15 = vadd.f32 %v1167_v13, %v923_v7  ;;  %v1126_v16 = vpop.f32.mrb[10].mxu1  ;;  %v1169_v17 = vpop.f32.mrb[14].mxu0 }
 0x214   :  { %v1127_v18 = vadd.f32 %v1126_v16, %v911_v4  ;;  %v1170_v19 = vadd.f32 %v1169_v17, %v919_v5  ;;  %v1128_v20 = vpop.f32.mrb[11].mxu1  ;;  %v1171_v21 = vpop.f32.mrb[15].mxu0  ;;  %v1174_v24 = vmax.f32 %v1123_v10, 0.0  ;;  %v1176_v25 = vmax.f32 %v1166_v11, 0.0 }
 0x215   :  { %v1129_v22 = vadd.f32 %v1128_v20, %v915_v6  ;;  %v1172_v23 = vadd.f32 %v1171_v21, %v923_v7  ;;  %v1175_v28 = vmax.f32 %v1125_v14, 0.0  ;;  %v1177_v29 = vmax.f32 %v1168_v15, 0.0 }
 0x216   :  { %v1178_v26 = vmax.f32 %v1127_v18, 0.0  ;;  %v1180_v27 = vmax.f32 %v1170_v19, 0.0 }
 0x217   :  { %v1179_v30 = vmax.f32 %v1129_v22, 0.0  ;;  %v1181_v31 = vmax.f32 %v1172_v23, 0.0 }
 0x218   :  { %v1182_v32 = vpack.c.bf16 %v1178_v26, %v1174_v24  ;;  %v1184_v33 = vpack.c.bf16 %v1180_v27, %v1176_v25 }
 0x219   :  { %v1183_v34 = vpack.c.bf16 %v1179_v30, %v1175_v28  ;;  %v1185_v35 = vpack.c.bf16 %v1181_v31, %v1177_v29 }
 0x21b   :  { %1481 = vmatprep.mubr.bf16.mxu1 %v1183_v34  ;;  %1522 = vmatprep.mubr.bf16.mxu0 %v1185_v35 }
 0x21c   :  { %1482 = vmatmul.mubr.bf16.vlgmr.msra.gmra.mrb[12].mxu1 %v1182_v32  ;;  %1523 = vmatmul.mubr.bf16.vlgmr.msra.gmra.mrb[16].mxu0 %v1184_v33 }
 0x2ef   :  { %v1797_v36 = vpop.f32.mrb[12].mxu1  ;;  %v1819_v37 = vpop.f32.mrb[16].mxu0 }
 0x2f0   :  { %v1798_v39 = vpop.f32.mrb[13].mxu1  ;;  %v1820_v40 = vpop.f32.mrb[17].mxu0 }
 0x2f1   :  { %v1799_v41 = vadd.f32 %v1798_v39, %v1797_v36  ;;  %v1821_v42 = vadd.f32 %v1820_v40, %v1819_v37  ;;  %v1800_v43 = vpop.f32.mrb[14].mxu1  ;;  %v1822_v44 = vpop.f32.mrb[18].mxu0 }
 0x2f2   :  { %v1801_v45 = vpop.f32.mrb[15].mxu1  ;;  %v1823_v46 = vpop.f32.mrb[19].mxu0 }
 0x2f3   :  { %v1484_v47 = vadd.f32 %v1799_v41, %v1651_v38  ;;  %v1802_v48 = vadd.f32 %v1801_v45, %v1800_v43  ;;  %v1824_v49 = vadd.f32 %v1823_v46, %v1822_v44 }
 0x2f5   :  { %v1525_v50 = vadd.f32 %v1821_v42, %v1484_v47  ;;  %v1487_v51 = vadd.f32 %v1802_v48, %v1651_v38 }
 0x2f7   :  { %1531 = vst [vmem:[%s2513_s7] sm:$0xff] %v1525_v50  ;;  %v1528_v52 = vadd.f32 %v1824_v49, %v1487_v51 }
 0x2f9   :  { %1532 = vst [vmem:[%s2513_s7 + $0x8] sm:$0xff] %v1528_v52 }

</bundles_post_ra>
